<compile_context>
chip_gen: v7x
topology: tpu7x:2x2x1
jax: 0.10.0
libtpu: 0.0.40
codegen_flags: <defaults>
</compile_context>

<pallas_src>
import functools
import math

import jax
import jax.numpy as jnp
import numpy as np
from jax.experimental import pallas as pl
from jax.experimental.pallas import tpu as pltpu


def _layernorm(v, w, b, eps=1e-5):
    mu = jnp.mean(v, axis=-1, keepdims=True)
    c = v - mu
    var = jnp.mean(c * c, axis=-1, keepdims=True)
    return c * jax.lax.rsqrt(var + eps) * w + b


def transformer_block_kernel(
    # inputs
    x_ref,                 # (1, N, D) f32 (full sequence of batch b)
    ln1w_ref, ln1b_ref,    # (1, D) f32
    wq_ref,                # (D, D)  bf16, 1/sqrt(hd) folded in
    wkv_ref,               # (D, 2D) bf16   [Wk | Wv]
    wo_ref,                # (D, D)  bf16
    ln2w_ref, ln2b_ref,    # (1, D) f32
    fc1w_ref, fc1b_ref,    # (D, D) bf16 / (1, D) f32
    fc2w_ref, fc2b_ref,    # (D, D) bf16 / (1, D) f32
    # output
    o_ref,                 # (1, TQ, D) f32
    # scratch
    k_s, v_s,              # (H, N, hd) bf16 (persist across the query-tile axis)
    ctx_s,                 # (TQ, D) bf16 lane-dense per-head context assembly
    *, num_heads, head_dims, hidden, q_tile, num_tiles,
):
    t = pl.program_id(1)
    bf16 = jnp.bfloat16

    # ---- once per batch element: row-chunked LN1 + K/V projection into scratch ----
    @pl.when(t == 0)
    def _():
        @pl.loop(0, num_tiles)
        def _(c):
            r0 = pl.multiple_of(c * q_tile, q_tile)
            xc = x_ref[0, pl.ds(r0, q_tile), :]                       # (TQ, D) f32
            hc = _layernorm(xc, ln1w_ref[0], ln1b_ref[0]).astype(bf16)
            kv = jnp.dot(hc, wkv_ref[...],
                         preferred_element_type=jnp.float32)          # (TQ, 2D) f32
            for hh in range(num_heads):
                lo = hh * head_dims
                k_s[hh, pl.ds(r0, q_tile), :] = kv[:, lo:lo + head_dims].astype(bf16)
                v_s[hh, pl.ds(r0, q_tile), :] = (
                    kv[:, hidden + lo:hidden + lo + head_dims].astype(bf16))

    # ---- per query tile ----
    start = pl.multiple_of(t * q_tile, q_tile)
    x_tile = x_ref[0, pl.ds(start, q_tile), :]                        # (TQ, D) f32
    h1 = _layernorm(x_tile, ln1w_ref[0], ln1b_ref[0]).astype(bf16)
    q = jnp.dot(h1, wq_ref[...], preferred_element_type=jnp.float32)  # scaled (TQ, D)
    q = q.astype(bf16)

    # attention per head: bounds live logits to (TQ, N); normalize after P@V.
    for hh in range(num_heads):
        lo = hh * head_dims
        q_h = q[:, lo:lo + head_dims]                                  # (TQ, hd) bf16
        logits = jnp.einsum("qd,kd->qk", q_h, k_s[hh],
                            preferred_element_type=jnp.float32)        # (TQ, N) f32
        m = jnp.max(logits, axis=-1, keepdims=True)
        p = jnp.exp(logits - m)                                        # unnormalized
        denom = jnp.sum(p, axis=-1, keepdims=True)
        ctx = jnp.dot(p.astype(bf16), v_s[hh],
                      preferred_element_type=jnp.float32)              # (TQ, hd) f32
        ctx = ctx * pl.reciprocal(denom, approx=True)                  # post-PV norm
        ctx_s[:, lo:lo + head_dims] = ctx.astype(bf16)

    # output projection: one full-depth (TQ, D) @ (D, D) MXU matmul on lane-dense ctx.
    attn_out = jnp.dot(ctx_s[...], wo_ref[...],
                       preferred_element_type=jnp.float32)             # (TQ, D) f32
    out1 = attn_out + x_tile                                           # residual 1

    # ---- norm2 + MLP (tanh GELU rides the EUP slot) ----
    h2 = _layernorm(out1, ln2w_ref[0], ln2b_ref[0])
    m1 = jnp.dot(h2.astype(bf16), fc1w_ref[...],
                 preferred_element_type=jnp.float32) + fc1b_ref[0]
    m1 = jax.nn.gelu(m1, approximate=True)
    m2 = jnp.dot(m1.astype(bf16), fc2w_ref[...],
                 preferred_element_type=jnp.float32) + fc2b_ref[0]

    o_ref[0] = m2 + out1                                               # residual 2


def _make_spec(shape, index_map, *, buffer_count=None):
    """BlockSpec helper; requests single-buffering for grid-invariant blocks."""
    if buffer_count is None:
        return pl.BlockSpec(shape, index_map)
    try:
        return pl.BlockSpec(shape, index_map, pipeline_mode=pl.Buffered(buffer_count))
    except Exception:
        # Fallback for environments without pipeline_mode support.
        return pl.BlockSpec(shape, index_map)


def _vmem_limit_bytes():
    # ~80% of physical VMEM per core: ~51 MiB on v7x (64 MiB), ~102 MiB on v5e/v6e
    # (128 MiB) — keeps headroom for compiler-internal scratch.
    cap = 128 * 1024 * 1024
    try:
        info = pltpu.get_tpu_info()
        cap = int(getattr(info, "vmem_capacity_bytes", cap))
    except Exception:
        pass
    return max(32 * 1024 * 1024, int(cap * 0.8))


def transformer_block(x, params, *, num_heads, q_tile=None):
    B, N, D = x.shape
    assert D % num_heads == 0
    hd = D // num_heads
    if q_tile is None:
        q_tile = N if N <= 256 else 256
    assert N % q_tile == 0, "sequence length must be a multiple of the query tile"
    num_tiles = N // q_tile

    bf16 = jnp.bfloat16
    # Wrapper-side weight prep: 1/sqrt(hd) folded into Wq (zero kernel cost);
    # Wk|Wv fused so the resident K/V projection is one matmul.
    wq = (params["wq"] * (hd ** -0.5)).astype(bf16)
    wkv = jnp.concatenate([params["wk"], params["wv"]], axis=1).astype(bf16)
    wo = params["wo"].astype(bf16)
    fc1w = params["fc1_w"].astype(bf16)
    fc2w = params["fc2_w"].astype(bf16)

    # Grid-invariant blocks single-buffered (constant / batch-only index_map);
    # double-buffering them buys nothing and wastes VMEM (critical on v7x).
    x_spec = _make_spec((1, N, D), lambda b, t: (b, 0, 0), buffer_count=1)
    vec_spec = _make_spec((1, D), lambda b, t: (0, 0), buffer_count=1)
    wq_spec = _make_spec((D, D), lambda b, t: (0, 0), buffer_count=1)
    wkv_spec = _make_spec((D, 2 * D), lambda b, t: (0, 0), buffer_count=1)
    fc_spec = _make_spec((D, D), lambda b, t: (0, 0), buffer_count=1)
    out_spec = pl.BlockSpec((1, q_tile, D), lambda b, t: (b, t, 0))

    kernel = functools.partial(
        transformer_block_kernel,
        num_heads=num_heads, head_dims=hd, hidden=D, q_tile=q_tile, num_tiles=num_tiles,
    )

    flops = int(2 * B * N * D * 3 * D          # Q + K/V projections
                + 4 * B * N * N * D            # attention (logits + P@V)
                + 2 * B * N * D * D            # output projection
                + 4 * B * N * D * D)           # MLP (fc1 + fc2)
    transcendentals = int(B * num_heads * N * N + B * N * D + 4 * B * N)
    bytes_accessed = int(2 * B * N * D * 4
                         + (wq.size + wkv.size + wo.size + fc1w.size + fc2w.size) * 2
                         + 8 * D * 4)

    return pl.pallas_call(
        kernel,
        out_shape=jax.ShapeDtypeStruct((B, N, D), jnp.float32),
        grid_spec=pltpu.PrefetchScalarGridSpec(
            num_scalar_prefetch=0,
            grid=(B, num_tiles),
            in_specs=[
                x_spec,
                vec_spec, vec_spec,        # ln1 w, b
                wq_spec,                   # Wq (scaled, bf16)
                wkv_spec,                  # fused Wk|Wv (bf16)
                pl.BlockSpec((D, D), lambda b, t: (0, 0)) if False else
                _make_spec((D, D), lambda b, t: (0, 0), buffer_count=1),  # Wo (bf16)
                vec_spec, vec_spec,        # ln2 w, b
                fc_spec, vec_spec,         # fc1 w (bf16), b
                fc_spec, vec_spec,         # fc2 w (bf16), b
            ],
            out_specs=out_spec,
            scratch_shapes=[
                pltpu.VMEM((num_heads, N, hd), bf16),   # K
                pltpu.VMEM((num_heads, N, hd), bf16),   # V
                pltpu.VMEM((q_tile, D), bf16),          # lane-dense per-head context
            ],
        ),
        compiler_params=pltpu.CompilerParams(
            # batch axis parallel (megacore / v7x 2 TCs); the query-tile axis carries
            # the K/V scratch written at tile 0 so it must remain "arbitrary".
            dimension_semantics=("parallel", "arbitrary"),
            vmem_limit_bytes=_vmem_limit_bytes(),
        ),
        cost_estimate=pl.CostEstimate(
            flops=flops, transcendentals=transcendentals, bytes_accessed=bytes_accessed),
    )(
        x,
        params["ln1_w"], params["ln1_b"],
        wq, wkv, wo,
        params["ln2_w"], params["ln2_b"],
        fc1w, params["fc1_b"],
        fc2w, params["fc2_b"],
    )


def init_params(key, D):
    # Matches the PyTorch module init: Linear weights ~ Xavier normal (all square, D->D),
    # attention has no bias, MLP biases filled with 0.1, LayerNorm weight=1 / bias=0.
    keys = jax.random.split(key, 6)
    std = math.sqrt(2.0 / (D + D))
    def xav(k):
        return jax.random.normal(k, (D, D), jnp.float32) * std
    return {
        "ln1_w": jnp.ones((1, D), jnp.float32),
        "ln1_b": jnp.zeros((1, D), jnp.float32),
        "wq": xav(keys[0]),
        "wk": xav(keys[1]),
        "wv": xav(keys[2]),
        "wo": xav(keys[3]),
        "ln2_w": jnp.ones((1, D), jnp.float32),
        "ln2_b": jnp.zeros((1, D), jnp.float32),
        "fc1_w": xav(keys[4]),
        "fc1_b": jnp.full((1, D), 0.1, jnp.float32),
        "fc2_w": xav(keys[5]),
        "fc2_b": jnp.full((1, D), 0.1, jnp.float32),
    }


def reference_forward(x, p, num_heads):
    # Pure-JAX f32 reference mirroring the PyTorch forward (exact-erf GELU).
    B, N, D = x.shape
    hd = D // num_heads

    def ln(v, w, b):
        mu = jnp.mean(v, axis=-1, keepdims=True)
        var = jnp.mean((v - mu) ** 2, axis=-1, keepdims=True)
        return (v - mu) / jnp.sqrt(var + 1e-5) * w[0] + b[0]

    skip = x
    h = ln(x, p["ln1_w"], p["ln1_b"])
    q = h @ p["wq"]; k = h @ p["wk"]; v = h @ p["wv"]
    q = q.reshape(B, N, num_heads, hd).transpose(0, 2, 1, 3)
    k = k.reshape(B, N, num_heads, hd).transpose(0, 2, 1, 3)
    v = v.reshape(B, N, num_heads, hd).transpose(0, 2, 1, 3)
    logits = jnp.einsum("bhnd,bhmd->bhnm", q, k) / hd ** 0.5
    attn_w = jax.nn.softmax(logits, axis=-1)
    a = jnp.einsum("bhnm,bhmd->bhnd", attn_w, v).transpose(0, 2, 1, 3).reshape(B, N, D)
    a = a @ p["wo"]
    out1 = a + skip
    h2 = ln(out1, p["ln2_w"], p["ln2_b"])
    m = jax.nn.gelu(h2 @ p["fc1_w"] + p["fc1_b"][0], approximate=False)
    m = m @ p["fc2_w"] + p["fc2_b"][0]
    return m + out1


if __name__ == "__main__":
    configs = [
        # (B, N, D, heads, q_tile)
        (2, 8, 32, 4, None),    # single query tile
        (2, 32, 32, 4, 16),     # two query tiles: exercises tile axis + K/V scratch reuse
    ]
    for (B, N, D, H, TQ) in configs:
        key = jax.random.PRNGKey(0)
        kx, kp = jax.random.split(key)
        x = jax.random.normal(kx, (B, N, D), jnp.float32)
        params = init_params(kp, D)

        out = jax.block_until_ready(transformer_block(x, params, num_heads=H, q_tile=TQ))
        ref = reference_forward(x, params, H)
        # bf16 MXU operands (f32 accumulation) + approx reciprocal + tanh GELU
        # => compare with a bf16-appropriate tolerance against the exact f32 reference.
        np.testing.assert_allclose(np.asarray(out), np.asarray(ref), rtol=3e-2, atol=3e-2)

    print("KERNEL_OK")
</pallas_src>

<mosaic_0001>
module attributes {stable_mosaic.version = 11 : i64} {
  func.func @transformer_block_kernel(%arg0: i32, %arg1: i32, %arg2: memref<1x8x32xf32, #tpu.memory_space<vmem>>, %arg3: memref<1x32xf32, #tpu.memory_space<vmem>>, %arg4: memref<1x32xf32, #tpu.memory_space<vmem>>, %arg5: memref<32x32xbf16, #tpu.memory_space<vmem>>, %arg6: memref<32x64xbf16, #tpu.memory_space<vmem>>, %arg7: memref<32x32xbf16, #tpu.memory_space<vmem>>, %arg8: memref<1x32xf32, #tpu.memory_space<vmem>>, %arg9: memref<1x32xf32, #tpu.memory_space<vmem>>, %arg10: memref<32x32xbf16, #tpu.memory_space<vmem>>, %arg11: memref<1x32xf32, #tpu.memory_space<vmem>>, %arg12: memref<32x32xbf16, #tpu.memory_space<vmem>>, %arg13: memref<1x32xf32, #tpu.memory_space<vmem>>, %arg14: memref<1x8x32xf32, #tpu.memory_space<vmem>>, %arg15: memref<4x8x8xbf16, #tpu.memory_space<vmem>>, %arg16: memref<4x8x8xbf16, #tpu.memory_space<vmem>>, %arg17: memref<8x32xbf16, #tpu.memory_space<vmem>>) attributes {dimension_semantics = [#tpu.dimension_semantics<parallel>, #tpu.dimension_semantics<arbitrary>], iteration_bounds = array<i64: 2, 1>, scalar_prefetch = 0 : i64, scratch_operands = 3 : i64, tpu.core_type = #tpu.core_type<tc>, window_params = [{pipeline_mode = #tpu.pipeline_mode<synchronous>, transform_indices = @transform_0, window_bounds = array<i64: 1, 8, 32>}, {pipeline_mode = #tpu.pipeline_mode<synchronous>, transform_indices = @transform_1, window_bounds = array<i64: 1, 32>}, {pipeline_mode = #tpu.pipeline_mode<synchronous>, transform_indices = @transform_2, window_bounds = array<i64: 1, 32>}, {pipeline_mode = #tpu.pipeline_mode<synchronous>, transform_indices = @transform_3, window_bounds = array<i64: 32, 32>}, {pipeline_mode = #tpu.pipeline_mode<synchronous>, transform_indices = @transform_4, window_bounds = array<i64: 32, 64>}, {pipeline_mode = #tpu.pipeline_mode<synchronous>, transform_indices = @transform_5, window_bounds = array<i64: 32, 32>}, {pipeline_mode = #tpu.pipeline_mode<synchronous>, transform_indices = @transform_6, window_bounds = array<i64: 1, 32>}, {pipeline_mode = #tpu.pipeline_mode<synchronous>, transform_indices = @transform_7, window_bounds = array<i64: 1, 32>}, {pipeline_mode = #tpu.pipeline_mode<synchronous>, transform_indices = @transform_8, window_bounds = array<i64: 32, 32>}, {pipeline_mode = #tpu.pipeline_mode<synchronous>, transform_indices = @transform_9, window_bounds = array<i64: 1, 32>}, {pipeline_mode = #tpu.pipeline_mode<synchronous>, transform_indices = @transform_10, window_bounds = array<i64: 32, 32>}, {pipeline_mode = #tpu.pipeline_mode<synchronous>, transform_indices = @transform_11, window_bounds = array<i64: 1, 32>}, {transform_indices = @transform_12, window_bounds = array<i64: 1, 8, 32>}]} {
    %c0_i32 = arith.constant 0 : i32
    %0 = arith.cmpi eq, %arg1, %c0_i32 : i32
    %1 = arith.extui %0 : i1 to i32
    %c0_i32_0 = arith.constant 0 : i32
    %2 = arith.cmpi ne, %1, %c0_i32_0 : i32
    scf.if %2 {
      %c0_i32_86 = arith.constant 0 : i32
      %c1_i32 = arith.constant 1 : i32
      %181 = arith.muli %c0_i32_86, %c1_i32 : i32
      %c0_i32_87 = arith.constant 0 : i32
      %182 = arith.addi %c0_i32_87, %181 : i32
      %c8_i32_88 = arith.constant 8 : i32
      %183 = arith.muli %182, %c8_i32_88 : i32
      %184 = tpu.assume_multiple %183, 8 : i32
      %c0_89 = arith.constant 0 : index
      %185 = arith.index_cast %184 : i32 to index
      %c0_90 = arith.constant 0 : index
      %186 = vector.load %arg2[%c0_89, %185, %c0_90] : memref<1x8x32xf32, #tpu.memory_space<vmem>>, vector<1x8x32xf32>
      %187 = vector.shape_cast %186 : vector<1x8x32xf32> to vector<8x32xf32>
      %c0_91 = arith.constant 0 : index
      %c0_92 = arith.constant 0 : index
      %188 = vector.load %arg3[%c0_91, %c0_92] : memref<1x32xf32, #tpu.memory_space<vmem>>, vector<1x32xf32>
      %189 = vector.shape_cast %188 : vector<1x32xf32> to vector<32xf32>
      %c0_93 = arith.constant 0 : index
      %c0_94 = arith.constant 0 : index
      %190 = vector.load %arg4[%c0_93, %c0_94] : memref<1x32xf32, #tpu.memory_space<vmem>>, vector<1x32xf32>
      %191 = vector.shape_cast %190 : vector<1x32xf32> to vector<32xf32>
      %cst_95 = arith.constant dense<0.000000e+00> : vector<8xf32>
      %192 = vector.multi_reduction <add>, %187, %cst_95 [1] : vector<8x32xf32> to vector<8xf32>
      %193 = vector.shape_cast %192 : vector<8xf32> to vector<8x1xf32>
      %cst_96 = arith.constant 3.200000e+01 : f32
      %194 = vector.broadcast %cst_96 : f32 to vector<8x1xf32>
      %195 = arith.divf %193, %194 : vector<8x1xf32>
      %196 = vector.broadcast %195 : vector<8x1xf32> to vector<8x32xf32>
      %197 = arith.subf %187, %196 : vector<8x32xf32>
      %198 = arith.mulf %197, %197 : vector<8x32xf32>
      %cst_97 = arith.constant dense<0.000000e+00> : vector<8xf32>
      %199 = vector.multi_reduction <add>, %198, %cst_97 [1] : vector<8x32xf32> to vector<8xf32>
      %200 = vector.shape_cast %199 : vector<8xf32> to vector<8x1xf32>
      %cst_98 = arith.constant 3.200000e+01 : f32
      %201 = vector.broadcast %cst_98 : f32 to vector<8x1xf32>
      %202 = arith.divf %200, %201 : vector<8x1xf32>
      %cst_99 = arith.constant 9.99999974E-6 : f32
      %203 = vector.broadcast %cst_99 : f32 to vector<8x1xf32>
      %204 = arith.addf %202, %203 : vector<8x1xf32>
      %205 = math.rsqrt %204 : vector<8x1xf32>
      %206 = vector.broadcast %205 : vector<8x1xf32> to vector<8x32xf32>
      %207 = arith.mulf %197, %206 : vector<8x32xf32>
      %208 = vector.shape_cast %189 : vector<32xf32> to vector<1x32xf32>
      %209 = vector.broadcast %208 : vector<1x32xf32> to vector<8x32xf32>
      %210 = arith.mulf %207, %209 : vector<8x32xf32>
      %211 = vector.shape_cast %191 : vector<32xf32> to vector<1x32xf32>
      %212 = vector.broadcast %211 : vector<1x32xf32> to vector<8x32xf32>
      %213 = arith.addf %210, %212 : vector<8x32xf32>
      %214 = arith.truncf %213 : vector<8x32xf32> to vector<8x32xbf16>
      %c0_100 = arith.constant 0 : index
      %c0_101 = arith.constant 0 : index
      %215 = vector.load %arg6[%c0_100, %c0_101] : memref<32x64xbf16, #tpu.memory_space<vmem>>, vector<32x64xbf16>
      %cst_102 = arith.constant dense<0.000000e+00> : vector<8x64xf32>
      %216 = tpu.matmul %214, %215, %cst_102 {dimension_numbers = #tpu.dot_dimension_numbers<[1], [0], [0], [1], [0, 0, 1, 1], [], []>} : vector<8x32xbf16>, vector<32x64xbf16>, vector<8x64xf32> -> vector<8x64xf32>
      %217 = vector.extract_strided_slice %216 {offsets = [0, 0], sizes = [8, 8], strides = [1, 1]} : vector<8x64xf32> to vector<8x8xf32>
      %218 = arith.truncf %217 : vector<8x8xf32> to vector<8x8xbf16>
      %c0_103 = arith.constant 0 : index
      %219 = arith.index_cast %184 : i32 to index
      %c0_104 = arith.constant 0 : index
      %220 = vector.load %arg15[%c0_103, %219, %c0_104] : memref<4x8x8xbf16, #tpu.memory_space<vmem>>, vector<1x8x8xbf16>
      %221 = vector.shape_cast %220 : vector<1x8x8xbf16> to vector<8x8xbf16>
      %222 = vector.shape_cast %218 : vector<8x8xbf16> to vector<1x8x8xbf16>
      tpu.vector_store %arg15[%c0_103, %219, %c0_104], %222 {strides = array<i32>} : memref<4x8x8xbf16, #tpu.memory_space<vmem>>, vector<1x8x8xbf16>,
      %223 = vector.extract_strided_slice %216 {offsets = [0, 32], sizes = [8, 8], strides = [1, 1]} : vector<8x64xf32> to vector<8x8xf32>
      %224 = arith.truncf %223 : vector<8x8xf32> to vector<8x8xbf16>
      %c0_105 = arith.constant 0 : index
      %225 = arith.index_cast %184 : i32 to index
      %c0_106 = arith.constant 0 : index
      %226 = vector.load %arg16[%c0_105, %225, %c0_106] : memref<4x8x8xbf16, #tpu.memory_space<vmem>>, vector<1x8x8xbf16>
      %227 = vector.shape_cast %226 : vector<1x8x8xbf16> to vector<8x8xbf16>
      %228 = vector.shape_cast %224 : vector<8x8xbf16> to vector<1x8x8xbf16>
      tpu.vector_store %arg16[%c0_105, %225, %c0_106], %228 {strides = array<i32>} : memref<4x8x8xbf16, #tpu.memory_space<vmem>>, vector<1x8x8xbf16>,
      %229 = vector.extract_strided_slice %216 {offsets = [0, 8], sizes = [8, 8], strides = [1, 1]} : vector<8x64xf32> to vector<8x8xf32>
      %230 = arith.truncf %229 : vector<8x8xf32> to vector<8x8xbf16>
      %c1_107 = arith.constant 1 : index
      %231 = arith.index_cast %184 : i32 to index
      %c0_108 = arith.constant 0 : index
      %232 = vector.load %arg15[%c1_107, %231, %c0_108] : memref<4x8x8xbf16, #tpu.memory_space<vmem>>, vector<1x8x8xbf16>
      %233 = vector.shape_cast %232 : vector<1x8x8xbf16> to vector<8x8xbf16>
      %234 = vector.shape_cast %230 : vector<8x8xbf16> to vector<1x8x8xbf16>
      tpu.vector_store %arg15[%c1_107, %231, %c0_108], %234 {strides = array<i32>} : memref<4x8x8xbf16, #tpu.memory_space<vmem>>, vector<1x8x8xbf16>,
      %235 = vector.extract_strided_slice %216 {offsets = [0, 40], sizes = [8, 8], strides = [1, 1]} : vector<8x64xf32> to vector<8x8xf32>
      %236 = arith.truncf %235 : vector<8x8xf32> to vector<8x8xbf16>
      %c1_109 = arith.constant 1 : index
      %237 = arith.index_cast %184 : i32 to index
      %c0_110 = arith.constant 0 : index
      %238 = vector.load %arg16[%c1_109, %237, %c0_110] : memref<4x8x8xbf16, #tpu.memory_space<vmem>>, vector<1x8x8xbf16>
      %239 = vector.shape_cast %238 : vector<1x8x8xbf16> to vector<8x8xbf16>
      %240 = vector.shape_cast %236 : vector<8x8xbf16> to vector<1x8x8xbf16>
      tpu.vector_store %arg16[%c1_109, %237, %c0_110], %240 {strides = array<i32>} : memref<4x8x8xbf16, #tpu.memory_space<vmem>>, vector<1x8x8xbf16>,
      %241 = vector.extract_strided_slice %216 {offsets = [0, 16], sizes = [8, 8], strides = [1, 1]} : vector<8x64xf32> to vector<8x8xf32>
      %242 = arith.truncf %241 : vector<8x8xf32> to vector<8x8xbf16>
      %c2_111 = arith.constant 2 : index
      %243 = arith.index_cast %184 : i32 to index
      %c0_112 = arith.constant 0 : index
      %244 = vector.load %arg15[%c2_111, %243, %c0_112] : memref<4x8x8xbf16, #tpu.memory_space<vmem>>, vector<1x8x8xbf16>
      %245 = vector.shape_cast %244 : vector<1x8x8xbf16> to vector<8x8xbf16>
      %246 = vector.shape_cast %242 : vector<8x8xbf16> to vector<1x8x8xbf16>
      tpu.vector_store %arg15[%c2_111, %243, %c0_112], %246 {strides = array<i32>} : memref<4x8x8xbf16, #tpu.memory_space<vmem>>, vector<1x8x8xbf16>,
      %247 = vector.extract_strided_slice %216 {offsets = [0, 48], sizes = [8, 8], strides = [1, 1]} : vector<8x64xf32> to vector<8x8xf32>
      %248 = arith.truncf %247 : vector<8x8xf32> to vector<8x8xbf16>
      %c2_113 = arith.constant 2 : index
      %249 = arith.index_cast %184 : i32 to index
      %c0_114 = arith.constant 0 : index
      %250 = vector.load %arg16[%c2_113, %249, %c0_114] : memref<4x8x8xbf16, #tpu.memory_space<vmem>>, vector<1x8x8xbf16>
      %251 = vector.shape_cast %250 : vector<1x8x8xbf16> to vector<8x8xbf16>
      %252 = vector.shape_cast %248 : vector<8x8xbf16> to vector<1x8x8xbf16>
      tpu.vector_store %arg16[%c2_113, %249, %c0_114], %252 {strides = array<i32>} : memref<4x8x8xbf16, #tpu.memory_space<vmem>>, vector<1x8x8xbf16>,
      %253 = vector.extract_strided_slice %216 {offsets = [0, 24], sizes = [8, 8], strides = [1, 1]} : vector<8x64xf32> to vector<8x8xf32>
      %254 = arith.truncf %253 : vector<8x8xf32> to vector<8x8xbf16>
      %c3_115 = arith.constant 3 : index
      %255 = arith.index_cast %184 : i32 to index
      %c0_116 = arith.constant 0 : index
      %256 = vector.load %arg15[%c3_115, %255, %c0_116] : memref<4x8x8xbf16, #tpu.memory_space<vmem>>, vector<1x8x8xbf16>
      %257 = vector.shape_cast %256 : vector<1x8x8xbf16> to vector<8x8xbf16>
      %258 = vector.shape_cast %254 : vector<8x8xbf16> to vector<1x8x8xbf16>
      tpu.vector_store %arg15[%c3_115, %255, %c0_116], %258 {strides = array<i32>} : memref<4x8x8xbf16, #tpu.memory_space<vmem>>, vector<1x8x8xbf16>,
      %259 = vector.extract_strided_slice %216 {offsets = [0, 56], sizes = [8, 8], strides = [1, 1]} : vector<8x64xf32> to vector<8x8xf32>
      %260 = arith.truncf %259 : vector<8x8xf32> to vector<8x8xbf16>
      %c3_117 = arith.constant 3 : index
      %261 = arith.index_cast %184 : i32 to index
      %c0_118 = arith.constant 0 : index
      %262 = vector.load %arg16[%c3_117, %261, %c0_118] : memref<4x8x8xbf16, #tpu.memory_space<vmem>>, vector<1x8x8xbf16>
      %263 = vector.shape_cast %262 : vector<1x8x8xbf16> to vector<8x8xbf16>
      %264 = vector.shape_cast %260 : vector<8x8xbf16> to vector<1x8x8xbf16>
      tpu.vector_store %arg16[%c3_117, %261, %c0_118], %264 {strides = array<i32>} : memref<4x8x8xbf16, #tpu.memory_space<vmem>>, vector<1x8x8xbf16>,
      %c1_i32_119 = arith.constant 1 : i32
    } else {
    }
    %c8_i32 = arith.constant 8 : i32
    %3 = arith.muli %arg1, %c8_i32 : i32
    %4 = tpu.assume_multiple %3, 8 : i32
    %c0 = arith.constant 0 : index
    %5 = arith.index_cast %4 : i32 to index
    %c0_1 = arith.constant 0 : index
    %6 = vector.load %arg2[%c0, %5, %c0_1] : memref<1x8x32xf32, #tpu.memory_space<vmem>>, vector<1x8x32xf32>
    %7 = vector.shape_cast %6 : vector<1x8x32xf32> to vector<8x32xf32>
    %c0_2 = arith.constant 0 : index
    %c0_3 = arith.constant 0 : index
    %8 = vector.load %arg3[%c0_2, %c0_3] : memref<1x32xf32, #tpu.memory_space<vmem>>, vector<1x32xf32>
    %9 = vector.shape_cast %8 : vector<1x32xf32> to vector<32xf32>
    %c0_4 = arith.constant 0 : index
    %c0_5 = arith.constant 0 : index
    %10 = vector.load %arg4[%c0_4, %c0_5] : memref<1x32xf32, #tpu.memory_space<vmem>>, vector<1x32xf32>
    %11 = vector.shape_cast %10 : vector<1x32xf32> to vector<32xf32>
    %cst = arith.constant dense<0.000000e+00> : vector<8xf32>
    %12 = vector.multi_reduction <add>, %7, %cst [1] : vector<8x32xf32> to vector<8xf32>
    %13 = vector.shape_cast %12 : vector<8xf32> to vector<8x1xf32>
    %cst_6 = arith.constant 3.200000e+01 : f32
    %14 = vector.broadcast %cst_6 : f32 to vector<8x1xf32>
    %15 = arith.divf %13, %14 : vector<8x1xf32>
    %16 = vector.broadcast %15 : vector<8x1xf32> to vector<8x32xf32>
    %17 = arith.subf %7, %16 : vector<8x32xf32>
    %18 = arith.mulf %17, %17 : vector<8x32xf32>
    %cst_7 = arith.constant dense<0.000000e+00> : vector<8xf32>
    %19 = vector.multi_reduction <add>, %18, %cst_7 [1] : vector<8x32xf32> to vector<8xf32>
    %20 = vector.shape_cast %19 : vector<8xf32> to vector<8x1xf32>
    %cst_8 = arith.constant 3.200000e+01 : f32
    %21 = vector.broadcast %cst_8 : f32 to vector<8x1xf32>
    %22 = arith.divf %20, %21 : vector<8x1xf32>
    %cst_9 = arith.constant 9.99999974E-6 : f32
    %23 = vector.broadcast %cst_9 : f32 to vector<8x1xf32>
    %24 = arith.addf %22, %23 : vector<8x1xf32>
    %25 = math.rsqrt %24 : vector<8x1xf32>
    %26 = vector.broadcast %25 : vector<8x1xf32> to vector<8x32xf32>
    %27 = arith.mulf %17, %26 : vector<8x32xf32>
    %28 = vector.shape_cast %9 : vector<32xf32> to vector<1x32xf32>
    %29 = vector.broadcast %28 : vector<1x32xf32> to vector<8x32xf32>
    %30 = arith.mulf %27, %29 : vector<8x32xf32>
    %31 = vector.shape_cast %11 : vector<32xf32> to vector<1x32xf32>
    %32 = vector.broadcast %31 : vector<1x32xf32> to vector<8x32xf32>
    %33 = arith.addf %30, %32 : vector<8x32xf32>
    %34 = arith.truncf %33 : vector<8x32xf32> to vector<8x32xbf16>
    %c0_10 = arith.constant 0 : index
    %c0_11 = arith.constant 0 : index
    %35 = vector.load %arg5[%c0_10, %c0_11] : memref<32x32xbf16, #tpu.memory_space<vmem>>, vector<32x32xbf16>
    %cst_12 = arith.constant dense<0.000000e+00> : vector<8x32xf32>
    %36 = tpu.matmul %34, %35, %cst_12 {dimension_numbers = #tpu.dot_dimension_numbers<[1], [0], [0], [1], [0, 0, 1, 1], [], []>} : vector<8x32xbf16>, vector<32x32xbf16>, vector<8x32xf32> -> vector<8x32xf32>
    %37 = arith.truncf %36 : vector<8x32xf32> to vector<8x32xbf16>
    %38 = vector.extract_strided_slice %37 {offsets = [0, 0], sizes = [8, 8], strides = [1, 1]} : vector<8x32xbf16> to vector<8x8xbf16>
    %c0_13 = arith.constant 0 : index
    %c0_14 = arith.constant 0 : index
    %c0_15 = arith.constant 0 : index
    %39 = vector.load %arg15[%c0_13, %c0_14, %c0_15] : memref<4x8x8xbf16, #tpu.memory_space<vmem>>, vector<1x8x8xbf16>
    %40 = vector.shape_cast %39 : vector<1x8x8xbf16> to vector<8x8xbf16>
    "tpu.trace_start"() <{level = 10 : i32, message = "qd,kd->qk"}> : () -> ()
    %cst_16 = arith.constant dense<0.000000e+00> : vector<8x8xf32>
    %41 = tpu.matmul %38, %40, %cst_16 {dimension_numbers = #tpu.dot_dimension_numbers<[1], [1], [0], [0], [0, 0, 1, 0], [], []>} : vector<8x8xbf16>, vector<8x8xbf16>, vector<8x8xf32> -> vector<8x8xf32>
    "tpu.trace_stop"() : () -> ()
    %cst_17 = arith.constant dense<0xFF800000> : vector<8xf32>
    %42 = vector.multi_reduction <maximumf>, %41, %cst_17 [1] : vector<8x8xf32> to vector<8xf32>
    %43 = vector.shape_cast %42 : vector<8xf32> to vector<8x1xf32>
    %44 = vector.broadcast %43 : vector<8x1xf32> to vector<8x8xf32>
    %45 = arith.subf %41, %44 : vector<8x8xf32>
    %46 = math.exp %45 : vector<8x8xf32>
    %cst_18 = arith.constant dense<0.000000e+00> : vector<8xf32>
    %47 = vector.multi_reduction <add>, %46, %cst_18 [1] : vector<8x8xf32> to vector<8xf32>
    %48 = vector.shape_cast %47 : vector<8xf32> to vector<8x1xf32>
    %49 = arith.truncf %46 : vector<8x8xf32> to vector<8x8xbf16>
    %c0_19 = arith.constant 0 : index
    %c0_20 = arith.constant 0 : index
    %c0_21 = arith.constant 0 : index
    %50 = vector.load %arg16[%c0_19, %c0_20, %c0_21] : memref<4x8x8xbf16, #tpu.memory_space<vmem>>, vector<1x8x8xbf16>
    %51 = vector.shape_cast %50 : vector<1x8x8xbf16> to vector<8x8xbf16>
    %cst_22 = arith.constant dense<0.000000e+00> : vector<8x8xf32>
    %52 = tpu.matmul %49, %51, %cst_22 {dimension_numbers = #tpu.dot_dimension_numbers<[1], [0], [0], [1], [0, 0, 1, 1], [], []>} : vector<8x8xbf16>, vector<8x8xbf16>, vector<8x8xf32> -> vector<8x8xf32>
    %53 = tpu.reciprocal %48 {approx = true} : vector<8x1xf32> -> vector<8x1xf32>
    %54 = vector.broadcast %53 : vector<8x1xf32> to vector<8x8xf32>
    %55 = arith.mulf %52, %54 : vector<8x8xf32>
    %56 = arith.truncf %55 : vector<8x8xf32> to vector<8x8xbf16>
    %c0_23 = arith.constant 0 : index
    %c0_24 = arith.constant 0 : index
    %57 = vector.load %arg17[%c0_23, %c0_24] : memref<8x32xbf16, #tpu.memory_space<vmem>>, vector<8x8xbf16>
    tpu.vector_store %arg17[%c0_23, %c0_24], %56 {strides = array<i32>} : memref<8x32xbf16, #tpu.memory_space<vmem>>, vector<8x8xbf16>,
    %58 = vector.extract_strided_slice %37 {offsets = [0, 8], sizes = [8, 8], strides = [1, 1]} : vector<8x32xbf16> to vector<8x8xbf16>
    %c1 = arith.constant 1 : index
    %c0_25 = arith.constant 0 : index
    %c0_26 = arith.constant 0 : index
    %59 = vector.load %arg15[%c1, %c0_25, %c0_26] : memref<4x8x8xbf16, #tpu.memory_space<vmem>>, vector<1x8x8xbf16>
    %60 = vector.shape_cast %59 : vector<1x8x8xbf16> to vector<8x8xbf16>
    "tpu.trace_start"() <{level = 10 : i32, message = "qd,kd->qk"}> : () -> ()
    %cst_27 = arith.constant dense<0.000000e+00> : vector<8x8xf32>
    %61 = tpu.matmul %58, %60, %cst_27 {dimension_numbers = #tpu.dot_dimension_numbers<[1], [1], [0], [0], [0, 0, 1, 0], [], []>} : vector<8x8xbf16>, vector<8x8xbf16>, vector<8x8xf32> -> vector<8x8xf32>
    "tpu.trace_stop"() : () -> ()
    %cst_28 = arith.constant dense<0xFF800000> : vector<8xf32>
    %62 = vector.multi_reduction <maximumf>, %61, %cst_28 [1] : vector<8x8xf32> to vector<8xf32>
    %63 = vector.shape_cast %62 : vector<8xf32> to vector<8x1xf32>
    %64 = vector.broadcast %63 : vector<8x1xf32> to vector<8x8xf32>
    %65 = arith.subf %61, %64 : vector<8x8xf32>
    %66 = math.exp %65 : vector<8x8xf32>
    %cst_29 = arith.constant dense<0.000000e+00> : vector<8xf32>
    %67 = vector.multi_reduction <add>, %66, %cst_29 [1] : vector<8x8xf32> to vector<8xf32>
    %68 = vector.shape_cast %67 : vector<8xf32> to vector<8x1xf32>
    %69 = arith.truncf %66 : vector<8x8xf32> to vector<8x8xbf16>
    %c1_30 = arith.constant 1 : index
    %c0_31 = arith.constant 0 : index
    %c0_32 = arith.constant 0 : index
    %70 = vector.load %arg16[%c1_30, %c0_31, %c0_32] : memref<4x8x8xbf16, #tpu.memory_space<vmem>>, vector<1x8x8xbf16>
    %71 = vector.shape_cast %70 : vector<1x8x8xbf16> to vector<8x8xbf16>
    %cst_33 = arith.constant dense<0.000000e+00> : vector<8x8xf32>
    %72 = tpu.matmul %69, %71, %cst_33 {dimension_numbers = #tpu.dot_dimension_numbers<[1], [0], [0], [1], [0, 0, 1, 1], [], []>} : vector<8x8xbf16>, vector<8x8xbf16>, vector<8x8xf32> -> vector<8x8xf32>
    %73 = tpu.reciprocal %68 {approx = true} : vector<8x1xf32> -> vector<8x1xf32>
    %74 = vector.broadcast %73 : vector<8x1xf32> to vector<8x8xf32>
    %75 = arith.mulf %72, %74 : vector<8x8xf32>
    %76 = arith.truncf %75 : vector<8x8xf32> to vector<8x8xbf16>
    %c0_34 = arith.constant 0 : index
    %c8 = arith.constant 8 : index
    %77 = vector.load %arg17[%c0_34, %c8] : memref<8x32xbf16, #tpu.memory_space<vmem>>, vector<8x8xbf16>
    tpu.vector_store %arg17[%c0_34, %c8], %76 {strides = array<i32>} : memref<8x32xbf16, #tpu.memory_space<vmem>>, vector<8x8xbf16>,
    %78 = vector.extract_strided_slice %37 {offsets = [0, 16], sizes = [8, 8], strides = [1, 1]} : vector<8x32xbf16> to vector<8x8xbf16>
    %c2 = arith.constant 2 : index
    %c0_35 = arith.constant 0 : index
    %c0_36 = arith.constant 0 : index
    %79 = vector.load %arg15[%c2, %c0_35, %c0_36] : memref<4x8x8xbf16, #tpu.memory_space<vmem>>, vector<1x8x8xbf16>
    %80 = vector.shape_cast %79 : vector<1x8x8xbf16> to vector<8x8xbf16>
    "tpu.trace_start"() <{level = 10 : i32, message = "qd,kd->qk"}> : () -> ()
    %cst_37 = arith.constant dense<0.000000e+00> : vector<8x8xf32>
    %81 = tpu.matmul %78, %80, %cst_37 {dimension_numbers = #tpu.dot_dimension_numbers<[1], [1], [0], [0], [0, 0, 1, 0], [], []>} : vector<8x8xbf16>, vector<8x8xbf16>, vector<8x8xf32> -> vector<8x8xf32>
    "tpu.trace_stop"() : () -> ()
    %cst_38 = arith.constant dense<0xFF800000> : vector<8xf32>
    %82 = vector.multi_reduction <maximumf>, %81, %cst_38 [1] : vector<8x8xf32> to vector<8xf32>
    %83 = vector.shape_cast %82 : vector<8xf32> to vector<8x1xf32>
    %84 = vector.broadcast %83 : vector<8x1xf32> to vector<8x8xf32>
    %85 = arith.subf %81, %84 : vector<8x8xf32>
    %86 = math.exp %85 : vector<8x8xf32>
    %cst_39 = arith.constant dense<0.000000e+00> : vector<8xf32>
    %87 = vector.multi_reduction <add>, %86, %cst_39 [1] : vector<8x8xf32> to vector<8xf32>
    %88 = vector.shape_cast %87 : vector<8xf32> to vector<8x1xf32>
    %89 = arith.truncf %86 : vector<8x8xf32> to vector<8x8xbf16>
    %c2_40 = arith.constant 2 : index
    %c0_41 = arith.constant 0 : index
    %c0_42 = arith.constant 0 : index
    %90 = vector.load %arg16[%c2_40, %c0_41, %c0_42] : memref<4x8x8xbf16, #tpu.memory_space<vmem>>, vector<1x8x8xbf16>
    %91 = vector.shape_cast %90 : vector<1x8x8xbf16> to vector<8x8xbf16>
    %cst_43 = arith.constant dense<0.000000e+00> : vector<8x8xf32>
    %92 = tpu.matmul %89, %91, %cst_43 {dimension_numbers = #tpu.dot_dimension_numbers<[1], [0], [0], [1], [0, 0, 1, 1], [], []>} : vector<8x8xbf16>, vector<8x8xbf16>, vector<8x8xf32> -> vector<8x8xf32>
    %93 = tpu.reciprocal %88 {approx = true} : vector<8x1xf32> -> vector<8x1xf32>
    %94 = vector.broadcast %93 : vector<8x1xf32> to vector<8x8xf32>
    %95 = arith.mulf %92, %94 : vector<8x8xf32>
    %96 = arith.truncf %95 : vector<8x8xf32> to vector<8x8xbf16>
    %c0_44 = arith.constant 0 : index
    %c16 = arith.constant 16 : index
    %97 = vector.load %arg17[%c0_44, %c16] : memref<8x32xbf16, #tpu.memory_space<vmem>>, vector<8x8xbf16>
    tpu.vector_store %arg17[%c0_44, %c16], %96 {strides = array<i32>} : memref<8x32xbf16, #tpu.memory_space<vmem>>, vector<8x8xbf16>,
    %98 = vector.extract_strided_slice %37 {offsets = [0, 24], sizes = [8, 8], strides = [1, 1]} : vector<8x32xbf16> to vector<8x8xbf16>
    %c3 = arith.constant 3 : index
    %c0_45 = arith.constant 0 : index
    %c0_46 = arith.constant 0 : index
    %99 = vector.load %arg15[%c3, %c0_45, %c0_46] : memref<4x8x8xbf16, #tpu.memory_space<vmem>>, vector<1x8x8xbf16>
    %100 = vector.shape_cast %99 : vector<1x8x8xbf16> to vector<8x8xbf16>
    "tpu.trace_start"() <{level = 10 : i32, message = "qd,kd->qk"}> : () -> ()
    %cst_47 = arith.constant dense<0.000000e+00> : vector<8x8xf32>
    %101 = tpu.matmul %98, %100, %cst_47 {dimension_numbers = #tpu.dot_dimension_numbers<[1], [1], [0], [0], [0, 0, 1, 0], [], []>} : vector<8x8xbf16>, vector<8x8xbf16>, vector<8x8xf32> -> vector<8x8xf32>
    "tpu.trace_stop"() : () -> ()
    %cst_48 = arith.constant dense<0xFF800000> : vector<8xf32>
    %102 = vector.multi_reduction <maximumf>, %101, %cst_48 [1] : vector<8x8xf32> to vector<8xf32>
    %103 = vector.shape_cast %102 : vector<8xf32> to vector<8x1xf32>
    %104 = vector.broadcast %103 : vector<8x1xf32> to vector<8x8xf32>
    %105 = arith.subf %101, %104 : vector<8x8xf32>
    %106 = math.exp %105 : vector<8x8xf32>
    %cst_49 = arith.constant dense<0.000000e+00> : vector<8xf32>
    %107 = vector.multi_reduction <add>, %106, %cst_49 [1] : vector<8x8xf32> to vector<8xf32>
    %108 = vector.shape_cast %107 : vector<8xf32> to vector<8x1xf32>
    %109 = arith.truncf %106 : vector<8x8xf32> to vector<8x8xbf16>
    %c3_50 = arith.constant 3 : index
    %c0_51 = arith.constant 0 : index
    %c0_52 = arith.constant 0 : index
    %110 = vector.load %arg16[%c3_50, %c0_51, %c0_52] : memref<4x8x8xbf16, #tpu.memory_space<vmem>>, vector<1x8x8xbf16>
    %111 = vector.shape_cast %110 : vector<1x8x8xbf16> to vector<8x8xbf16>
    %cst_53 = arith.constant dense<0.000000e+00> : vector<8x8xf32>
    %112 = tpu.matmul %109, %111, %cst_53 {dimension_numbers = #tpu.dot_dimension_numbers<[1], [0], [0], [1], [0, 0, 1, 1], [], []>} : vector<8x8xbf16>, vector<8x8xbf16>, vector<8x8xf32> -> vector<8x8xf32>
    %113 = tpu.reciprocal %108 {approx = true} : vector<8x1xf32> -> vector<8x1xf32>
    %114 = vector.broadcast %113 : vector<8x1xf32> to vector<8x8xf32>
    %115 = arith.mulf %112, %114 : vector<8x8xf32>
    %116 = arith.truncf %115 : vector<8x8xf32> to vector<8x8xbf16>
    %c0_54 = arith.constant 0 : index
    %c24 = arith.constant 24 : index
    %117 = vector.load %arg17[%c0_54, %c24] : memref<8x32xbf16, #tpu.memory_space<vmem>>, vector<8x8xbf16>
    tpu.vector_store %arg17[%c0_54, %c24], %116 {strides = array<i32>} : memref<8x32xbf16, #tpu.memory_space<vmem>>, vector<8x8xbf16>,
    %c0_55 = arith.constant 0 : index
    %c0_56 = arith.constant 0 : index
    %118 = vector.load %arg17[%c0_55, %c0_56] : memref<8x32xbf16, #tpu.memory_space<vmem>>, vector<8x32xbf16>
    %c0_57 = arith.constant 0 : index
    %c0_58 = arith.constant 0 : index
    %119 = vector.load %arg7[%c0_57, %c0_58] : memref<32x32xbf16, #tpu.memory_space<vmem>>, vector<32x32xbf16>
    %cst_59 = arith.constant dense<0.000000e+00> : vector<8x32xf32>
    %120 = tpu.matmul %118, %119, %cst_59 {dimension_numbers = #tpu.dot_dimension_numbers<[1], [0], [0], [1], [0, 0, 1, 1], [], []>} : vector<8x32xbf16>, vector<32x32xbf16>, vector<8x32xf32> -> vector<8x32xf32>
    %121 = arith.addf %120, %7 : vector<8x32xf32>
    %c0_60 = arith.constant 0 : index
    %c0_61 = arith.constant 0 : index
    %122 = vector.load %arg8[%c0_60, %c0_61] : memref<1x32xf32, #tpu.memory_space<vmem>>, vector<1x32xf32>
    %123 = vector.shape_cast %122 : vector<1x32xf32> to vector<32xf32>
    %c0_62 = arith.constant 0 : index
    %c0_63 = arith.constant 0 : index
    %124 = vector.load %arg9[%c0_62, %c0_63] : memref<1x32xf32, #tpu.memory_space<vmem>>, vector<1x32xf32>
    %125 = vector.shape_cast %124 : vector<1x32xf32> to vector<32xf32>
    %cst_64 = arith.constant dense<0.000000e+00> : vector<8xf32>
    %126 = vector.multi_reduction <add>, %121, %cst_64 [1] : vector<8x32xf32> to vector<8xf32>
    %127 = vector.shape_cast %126 : vector<8xf32> to vector<8x1xf32>
    %cst_65 = arith.constant 3.200000e+01 : f32
    %128 = vector.broadcast %cst_65 : f32 to vector<8x1xf32>
    %129 = arith.divf %127, %128 : vector<8x1xf32>
    %130 = vector.broadcast %129 : vector<8x1xf32> to vector<8x32xf32>
    %131 = arith.subf %121, %130 : vector<8x32xf32>
    %132 = arith.mulf %131, %131 : vector<8x32xf32>
    %cst_66 = arith.constant dense<0.000000e+00> : vector<8xf32>
    %133 = vector.multi_reduction <add>, %132, %cst_66 [1] : vector<8x32xf32> to vector<8xf32>
    %134 = vector.shape_cast %133 : vector<8xf32> to vector<8x1xf32>
    %cst_67 = arith.constant 3.200000e+01 : f32
    %135 = vector.broadcast %cst_67 : f32 to vector<8x1xf32>
    %136 = arith.divf %134, %135 : vector<8x1xf32>
    %cst_68 = arith.constant 9.99999974E-6 : f32
    %137 = vector.broadcast %cst_68 : f32 to vector<8x1xf32>
    %138 = arith.addf %136, %137 : vector<8x1xf32>
    %139 = math.rsqrt %138 : vector<8x1xf32>
    %140 = vector.broadcast %139 : vector<8x1xf32> to vector<8x32xf32>
    %141 = arith.mulf %131, %140 : vector<8x32xf32>
    %142 = vector.shape_cast %123 : vector<32xf32> to vector<1x32xf32>
    %143 = vector.broadcast %142 : vector<1x32xf32> to vector<8x32xf32>
    %144 = arith.mulf %141, %143 : vector<8x32xf32>
    %145 = vector.shape_cast %125 : vector<32xf32> to vector<1x32xf32>
    %146 = vector.broadcast %145 : vector<1x32xf32> to vector<8x32xf32>
    %147 = arith.addf %144, %146 : vector<8x32xf32>
    %148 = arith.truncf %147 : vector<8x32xf32> to vector<8x32xbf16>
    %c0_69 = arith.constant 0 : index
    %c0_70 = arith.constant 0 : index
    %149 = vector.load %arg10[%c0_69, %c0_70] : memref<32x32xbf16, #tpu.memory_space<vmem>>, vector<32x32xbf16>
    %cst_71 = arith.constant dense<0.000000e+00> : vector<8x32xf32>
    %150 = tpu.matmul %148, %149, %cst_71 {dimension_numbers = #tpu.dot_dimension_numbers<[1], [0], [0], [1], [0, 0, 1, 1], [], []>} : vector<8x32xbf16>, vector<32x32xbf16>, vector<8x32xf32> -> vector<8x32xf32>
    %c0_72 = arith.constant 0 : index
    %c0_73 = arith.constant 0 : index
    %151 = vector.load %arg11[%c0_72, %c0_73] : memref<1x32xf32, #tpu.memory_space<vmem>>, vector<1x32xf32>
    %152 = vector.shape_cast %151 : vector<1x32xf32> to vector<32xf32>
    %153 = vector.shape_cast %152 : vector<32xf32> to vector<1x32xf32>
    %154 = vector.broadcast %153 : vector<1x32xf32> to vector<8x32xf32>
    %155 = arith.addf %150, %154 : vector<8x32xf32>
    %156 = arith.mulf %155, %155 : vector<8x32xf32>
    %157 = arith.mulf %155, %156 : vector<8x32xf32>
    %cst_74 = arith.constant 4.471500e-02 : f32
    %158 = vector.broadcast %cst_74 : f32 to vector<8x32xf32>
    %159 = arith.mulf %158, %157 : vector<8x32xf32>
    %160 = arith.addf %155, %159 : vector<8x32xf32>
    %cst_75 = arith.constant 0.797884583 : f32
    %161 = vector.broadcast %cst_75 : f32 to vector<8x32xf32>
    %162 = arith.mulf %161, %160 : vector<8x32xf32>
    %163 = math.tanh %162 : vector<8x32xf32>
    %cst_76 = arith.constant 1.000000e+00 : f32
    %164 = vector.broadcast %cst_76 : f32 to vector<8x32xf32>
    %165 = arith.addf %164, %163 : vector<8x32xf32>
    %cst_77 = arith.constant 5.000000e-01 : f32
    %166 = vector.broadcast %cst_77 : f32 to vector<8x32xf32>
    %167 = arith.mulf %166, %165 : vector<8x32xf32>
    %168 = arith.mulf %155, %167 : vector<8x32xf32>
    %169 = arith.truncf %168 : vector<8x32xf32> to vector<8x32xbf16>
    %c0_78 = arith.constant 0 : index
    %c0_79 = arith.constant 0 : index
    %170 = vector.load %arg12[%c0_78, %c0_79] : memref<32x32xbf16, #tpu.memory_space<vmem>>, vector<32x32xbf16>
    %cst_80 = arith.constant dense<0.000000e+00> : vector<8x32xf32>
    %171 = tpu.matmul %169, %170, %cst_80 {dimension_numbers = #tpu.dot_dimension_numbers<[1], [0], [0], [1], [0, 0, 1, 1], [], []>} : vector<8x32xbf16>, vector<32x32xbf16>, vector<8x32xf32> -> vector<8x32xf32>
    %c0_81 = arith.constant 0 : index
    %c0_82 = arith.constant 0 : index
    %172 = vector.load %arg13[%c0_81, %c0_82] : memref<1x32xf32, #tpu.memory_space<vmem>>, vector<1x32xf32>
    %173 = vector.shape_cast %172 : vector<1x32xf32> to vector<32xf32>
    %174 = vector.shape_cast %173 : vector<32xf32> to vector<1x32xf32>
    %175 = vector.broadcast %174 : vector<1x32xf32> to vector<8x32xf32>
    %176 = arith.addf %171, %175 : vector<8x32xf32>
    %177 = arith.addf %176, %121 : vector<8x32xf32>
    %c0_83 = arith.constant 0 : index
    %c0_84 = arith.constant 0 : index
    %c0_85 = arith.constant 0 : index
    %178 = vector.load %arg14[%c0_83, %c0_84, %c0_85] : memref<1x8x32xf32, #tpu.memory_space<vmem>>, vector<1x8x32xf32>
    %179 = vector.shape_cast %178 : vector<1x8x32xf32> to vector<8x32xf32>
    %180 = vector.shape_cast %177 : vector<8x32xf32> to vector<1x8x32xf32>
    tpu.vector_store %arg14[%c0_83, %c0_84, %c0_85], %180 {strides = array<i32>} : memref<1x8x32xf32, #tpu.memory_space<vmem>>, vector<1x8x32xf32>,
    return
  }
  func.func @transform_0(%arg0: i32, %arg1: i32) -> (i32, i32, i32) {
    %c0_i32 = arith.constant 0 : i32
    %c0_i32_0 = arith.constant 0 : i32
    %c0_i32_1 = arith.constant 0 : i32
    return %arg0, %c0_i32, %c0_i32_0 : i32, i32, i32
  }
  func.func @transform_1(%arg0: i32, %arg1: i32) -> (i32, i32) {
    %c0_i32 = arith.constant 0 : i32
    %c0_i32_0 = arith.constant 0 : i32
    %c0_i32_1 = arith.constant 0 : i32
    return %c0_i32, %c0_i32_0 : i32, i32
  }
  func.func @transform_2(%arg0: i32, %arg1: i32) -> (i32, i32) {
    %c0_i32 = arith.constant 0 : i32
    %c0_i32_0 = arith.constant 0 : i32
    %c0_i32_1 = arith.constant 0 : i32
    return %c0_i32, %c0_i32_0 : i32, i32
  }
  func.func @transform_3(%arg0: i32, %arg1: i32) -> (i32, i32) {
    %c0_i32 = arith.constant 0 : i32
    %c0_i32_0 = arith.constant 0 : i32
    %c0_i32_1 = arith.constant 0 : i32
    return %c0_i32, %c0_i32_0 : i32, i32
  }
  func.func @transform_4(%arg0: i32, %arg1: i32) -> (i32, i32) {
    %c0_i32 = arith.constant 0 : i32
    %c0_i32_0 = arith.constant 0 : i32
    %c0_i32_1 = arith.constant 0 : i32
    return %c0_i32, %c0_i32_0 : i32, i32
  }
  func.func @transform_5(%arg0: i32, %arg1: i32) -> (i32, i32) {
    %c0_i32 = arith.constant 0 : i32
    %c0_i32_0 = arith.constant 0 : i32
    %c0_i32_1 = arith.constant 0 : i32
    return %c0_i32, %c0_i32_0 : i32, i32
  }
  func.func @transform_6(%arg0: i32, %arg1: i32) -> (i32, i32) {
    %c0_i32 = arith.constant 0 : i32
    %c0_i32_0 = arith.constant 0 : i32
    %c0_i32_1 = arith.constant 0 : i32
    return %c0_i32, %c0_i32_0 : i32, i32
  }
  func.func @transform_7(%arg0: i32, %arg1: i32) -> (i32, i32) {
    %c0_i32 = arith.constant 0 : i32
    %c0_i32_0 = arith.constant 0 : i32
    %c0_i32_1 = arith.constant 0 : i32
    return %c0_i32, %c0_i32_0 : i32, i32
  }
  func.func @transform_8(%arg0: i32, %arg1: i32) -> (i32, i32) {
    %c0_i32 = arith.constant 0 : i32
    %c0_i32_0 = arith.constant 0 : i32
    %c0_i32_1 = arith.constant 0 : i32
    return %c0_i32, %c0_i32_0 : i32, i32
  }
  func.func @transform_9(%arg0: i32, %arg1: i32) -> (i32, i32) {
    %c0_i32 = arith.constant 0 : i32
    %c0_i32_0 = arith.constant 0 : i32
    %c0_i32_1 = arith.constant 0 : i32
    return %c0_i32, %c0_i32_0 : i32, i32
  }
  func.func @transform_10(%arg0: i32, %arg1: i32) -> (i32, i32) {
    %c0_i32 = arith.constant 0 : i32
    %c0_i32_0 = arith.constant 0 : i32
    %c0_i32_1 = arith.constant 0 : i32
    return %c0_i32, %c0_i32_0 : i32, i32
  }
  func.func @transform_11(%arg0: i32, %arg1: i32) -> (i32, i32) {
    %c0_i32 = arith.constant 0 : i32
    %c0_i32_0 = arith.constant 0 : i32
    %c0_i32_1 = arith.constant 0 : i32
    return %c0_i32, %c0_i32_0 : i32, i32
  }
  func.func @transform_12(%arg0: i32, %arg1: i32) -> (i32, i32, i32) {
    %c0_i32 = arith.constant 0 : i32
    %c0_i32_0 = arith.constant 0 : i32
    return %arg0, %arg1, %c0_i32 : i32, i32, i32
  }
}

</mosaic_0001>

<bundles_post_ra>
// kernel: tpu_custom_call.1
= control target key start
LH: loop header
LB: loop body
LE: loop exit
PB: predicated region body
PF: predicated region fallthrough
CT: control target
= control target key end

     0   :  { %s3217_s0 = inlined_call_operand.hbm [shape: f32[2,8,32], index: 0, kind: input, shape index: {}]   ;;  %s3218_s1 = inlined_call_operand.hbm [shape: f32[1,32], index: 1, kind: input, shape index: {}]   ;;  %s3219_s2 = inlined_call_operand.hbm [shape: f32[1,32], index: 2, kind: input, shape index: {}]   ;;  %s3220_s3 = inlined_call_operand.hbm [shape: bf16[32,32], index: 3, kind: input, shape index: {}]   ;;  %s3221_s4 = inlined_call_operand.hbm [shape: bf16[32,64], index: 4, kind: input, shape index: {}]   ;;  %s3222_s5 = inlined_call_operand.hbm [shape: bf16[32,32], index: 5, kind: input, shape index: {}]   ;;  %s3223_s6 = inlined_call_operand.hbm [shape: f32[1,32], index: 6, kind: input, shape index: {}]   ;;  %s3224_s7 = inlined_call_operand.hbm [shape: f32[1,32], index: 7, kind: input, shape index: {}]   ;;  %s3225_s8 = inlined_call_operand.hbm [shape: bf16[32,32], index: 8, kind: input, shape index: {}]   ;;  %s3226_s9 = inlined_call_operand.hbm [shape: f32[1,32], index: 9, kind: input, shape index: {}]   ;;  %s3227_s10 = inlined_call_operand.hbm [shape: bf16[32,32], index: 10, kind: input, shape index: {}]   ;;  %s3228_s11 = inlined_call_operand.hbm [shape: f32[1,32], index: 11, kind: input, shape index: {}]   ;;  %s3229_s12 = inlined_call_operand.hbm [shape: f32[2,8,32], index: 12, kind: output, shape index: {}]  }
   0x1   :  { %3255 = sst [smem:[#allocation35_spill]] %s3217_s0 }
   0x2   :  { %3256 = sst [smem:[#allocation36_spill]] %s3218_s1 }
   0x3   :  { %3257 = sst [smem:[#allocation37_spill]] %s3219_s2 }
   0x4   :  { %3258 = sst [smem:[#allocation38_spill]] %s3220_s3 }
   0x5   :  { %3259 = sst [smem:[#allocation39_spill]] %s3221_s4 }
   0x6   :  { %3260 = sst [smem:[#allocation40_spill]] %s3222_s5 }
   0x7   :  { %3261 = sst [smem:[#allocation41_spill]] %s3223_s6 }
   0x8   :  { %3262 = sst [smem:[#allocation42_spill]] %s3224_s7 }
   0x9   :  { %3263 = sst [smem:[#allocation43_spill]] %s3225_s8 }
   0xa   :  { %3264 = sst [smem:[#allocation44_spill]] %s3226_s9 }
   0xb   :  { %3265 = sst [smem:[#allocation45_spill]] %s3227_s10 }
   0xc   :  { %3266 = sst [smem:[#allocation46_spill]] %s3228_s11 }
   0xd   :  { %3267 = sst [smem:[#allocation47_spill]] %s3229_s12 }
   0xe   :  { %17 = vsyncpa [#allocation6], 0 }
   0xf   :  { %18 = vsyncpa [#allocation9], 0 }
  0x10   :  { %19 = vsyncpa [#allocation12], 0 }
  0x11   :  { %20 = vsyncpa [#allocation15], 0 }
  0x12   :  { %21 = vsyncpa [#allocation18], 0 }
  0x13   :  { %22 = vsyncpa [#allocation21], 0 }
  0x14   :  { %23 = vsyncpa [#allocation24], 0 }
  0x15   :  { %24 = vsyncpa [#allocation7], 0 }
  0x16   :  { %26 = vsyncpa [#allocation7 + $0x1], 0  ;;  %s2664_s21 = smov 0   ;;  %s2666_s22 = smov 0  }
  0x17   :  { %s2668_s23 = smov 0   ;;  %s2670_s24 = smov 0  }
  0x18   :  { %s2672_s25 = smov 0   ;;  %s2674_s26 = smov 0  }
  0x19 LB: > { %s2572_s27 = smov [#allocation8]   ;;  %s3230_s29 = sadd.s32 4294967295, %s2570_s26   ;;  %s2570_s26 = sphi %s2674_s26, %s32_s26   ;;  %s2566_s25 = sphi %s2672_s25, %s3309_s25   ;;  %s2562_s24 = sphi %s2670_s24, %s3308_s24   ;;  %s2558_s23 = sphi %s2668_s23, %s3307_s23   ;;  %s2554_s22 = sphi %s2666_s22, %s3306_s22   ;;  %s2550_s21 = sphi %s2664_s21, %s3305_s21  }
  0x1a   : > { %s360_s28 = sshll.u32 %s2572_s27, 4  ;;  %p1718_p0 = scmp.ge.s32.totalorder %s2570_s26, 1  ;;  %s2703_s28 = int_to_ptr.vmem [resolvable:$true] %s360_s28 }
  0x1b   : > { %p2698_p1 = scmp.eq.s32.totalorder %s3230_s29, 0  ;;  %p334_p2 = scmp.lt.s32.totalorder %s2570_s26, 3 }
  0x1c   : > { %s2573_s14 = smov [#allocation11]   ;;  %s2574_s17 = smov [#allocation14]  }
  0x1d   : > { %s3268_s30 = scalar_select %p2698_p1, 1, 0 }
  0x1e   : > { %p2705_p3 = pnand %p1718_p0, %p334_p2  ;;  %s381_s15 = sshll.u32 %s2573_s14, 4  ;;  %s2711_s15 = int_to_ptr.vmem [resolvable:$true] %s381_s15 }
  0x1f   : > { %s407_s18 = sshll.u32 %s2574_s17, 4  ;;  %s2575_s19 = smov [#allocation17]   ;;  %s2722_s18 = int_to_ptr.vmem [resolvable:$true] %s407_s18 }
  0x20   : > { %s3269_s13 = scalar_select %p2705_p3, 1, 0 }
  0x21   : > { %p3234_p4 = pneg %p2705_p3  ;;  %s2724_s20 = sshll.u32 %s2575_s19, 4  ;;  %s433_s20 = int_to_ptr.vmem [resolvable:$true] %s2724_s20 }
  0x22   : > { %s3271_s1 = sld [smem:[#allocation36_spill]] }
  0x23   : > { %p2718_p5 = pnand %p3234_p4, %p2698_p1 }
  0x25   : > { %s3270_s16 = scalar_select %p2718_p5, 1, 0 }
  0x26   : > { %p2734_p7 = pneg %p2718_p5 }
  0x28   : > { %s2126_s29 = scalar_lea.hbm %s3271_s1, 16 }
  0x29   : > { %p2127_p6 = scmp.ne.s32.totalorder %s3271_s1, %s2126_s29  ;;  %p2133_p10 = scmp.lt.u32.totalorder %s2126_s29, %s3271_s1 }
  0x2a   : > { %s3272_s10 = scalar_select %p2734_p7, 1, 0 }
  0x2b   : > { %p2129_p8 = pnand %p2734_p7, %p2127_p6 }
  0x2d   : > { %p2130_p9 = pneg %p2129_p8 }
  0x2f   : > { %p2135_p11 = pnand %p2133_p10, %p2130_p9 }
  0x31   : > { %2138 = shalt.err (!%p2135_p11)
}
  0x32   : > { %s2139_s11 = scalar_lea.vmem %s2703_s28, 16  ;;  %s2146_s12 = scalar_lea.vmem %s2703_s28, 32 }
  0x33   : > { %p2140_p12 = scmp.ne.s32.totalorder %s2703_s28, %s2139_s11  ;;  %p2147_p2 = scmp.lt.s32.totalorder %s2703_s28, %s2703_s28 }
  0x34   : > { %p2148_p6 = scmp.lt.s32.totalorder %s2146_s12, %s2139_s11 }
  0x35   : > { %p2142_p13 = pnand %p2140_p12, %p2734_p7 }
  0x36   : > { %p2149_p8 = por %p2148_p6, %p2147_p2 }
  0x37   : > { %p2143_p0 = pneg %p2142_p13 }
  0x39   : > { %p2150_p4 = pnand %p2149_p8, %p2143_p0 }
  0x3b   : > { %2153 = shalt.err (!%p2150_p4)
}
  0x3c   : > { %1960 = dma.hbm_to_vmem [thread:$0]  (!%p2718_p5), %s3271_s1, 16, %s2703_s28, [#allocation9]  }
  0x3d   : > { %s3273_s3 = sld [smem:[#allocation38_spill]] }
  0x43   : > { %s2154_s19 = scalar_lea.hbm %s3273_s3, 256 }
  0x44   : > { %p2155_p9 = scmp.ne.s32.totalorder %s3273_s3, %s2154_s19  ;;  %p2161_p4 = scmp.lt.u32.totalorder %s2154_s19, %s3273_s3 }
  0x46   : > { %p2157_p10 = pnand %p2155_p9, %p2734_p7 }
  0x48   : > { %p2158_p11 = pneg %p2157_p10 }
  0x4a   : > { %p2163_p12 = pnand %p2161_p4, %p2158_p11 }
  0x4c   : > { %2166 = shalt.err (!%p2163_p12)
}
  0x4d   : > { %s2167_s28 = scalar_lea.vmem %s2711_s15, 256  ;;  %p2175_p6 = scmp.lt.s32.totalorder %s2711_s15, %s2711_s15 }
  0x4e   : > { %p2168_p13 = scmp.ne.s32.totalorder %s2711_s15, %s2167_s28  ;;  %p2176_p8 = scmp.lt.s32.totalorder %s2167_s28, %s2167_s28 }
  0x50   : > { %p2170_p0 = pnand %p2168_p13, %p2734_p7  ;;  %p2177_p9 = por %p2176_p8, %p2175_p6 }
  0x52   : > { %p2171_p2 = pneg %p2170_p0 }
  0x54   : > { %p2178_p10 = pnand %p2177_p9, %p2171_p2 }
  0x56   : > { %2181 = shalt.err (!%p2178_p10)
}
  0x57   : > { %s3241_s6 = smov 64   ;;  %s3244_s8 = smov 4  }
  0x58   : > { %1966 = dma.hbm_to_vmem [thread:$0]  (!%p2718_p5), %s3273_s3, 256, %s2711_s15, [#allocation12], %s3241_s6, %s3241_s6, %s3244_s8  }
  0x59   : > { %s3274_s5 = sld [smem:[#allocation40_spill]] }
  0x5f   : > { %s2182_s19 = scalar_lea.hbm %s3274_s5, 256 }
  0x60   : > { %p2183_p11 = scmp.ne.s32.totalorder %s3274_s5, %s2182_s19  ;;  %p2189_p13 = scmp.lt.u32.totalorder %s2182_s19, %s3274_s5 }
  0x62   : > { %p2185_p4 = pnand %p2183_p11, %p2734_p7 }
  0x64   : > { %p2186_p12 = pneg %p2185_p4 }
  0x66   : > { %p2191_p0 = pnand %p2189_p13, %p2186_p12 }
  0x68   : > { %2194 = shalt.err (!%p2191_p0)
}
  0x69   : > { %s2195_s15 = scalar_lea.vmem %s2722_s18, 256  ;;  %p2203_p9 = scmp.lt.s32.totalorder %s2722_s18, %s2722_s18 }
  0x6a   : > { %p2196_p2 = scmp.ne.s32.totalorder %s2722_s18, %s2195_s15  ;;  %p2204_p10 = scmp.lt.s32.totalorder %s2195_s15, %s2195_s15 }
  0x6c   : > { %p2198_p6 = pnand %p2196_p2, %p2734_p7  ;;  %p2205_p11 = por %p2204_p10, %p2203_p9 }
  0x6e   : > { %p2199_p8 = pneg %p2198_p6 }
  0x70   : > { %p2206_p4 = pnand %p2205_p11, %p2199_p8 }
  0x72   : > { %2209 = shalt.err (!%p2206_p4)
}
  0x73   : > { %1972 = dma.hbm_to_vmem [thread:$0]  (!%p2718_p5), %s3274_s5, 256, %s2722_s18, [#allocation15], %s3241_s6, %s3241_s6, %s3244_s8  }
  0x74   : > { %s3275_s7 = sld [smem:[#allocation42_spill]] }
  0x7a   : > { %s2210_s17 = scalar_lea.hbm %s3275_s7, 16 }
  0x7b   : > { %p2211_p12 = scmp.ne.s32.totalorder %s3275_s7, %s2210_s17  ;;  %p2217_p2 = scmp.lt.u32.totalorder %s2210_s17, %s3275_s7 }
  0x7d   : > { %p2213_p13 = pnand %p2211_p12, %p2734_p7 }
  0x7f   : > { %p2214_p0 = pneg %p2213_p13 }
  0x81   : > { %p2219_p6 = pnand %p2217_p2, %p2214_p0 }
  0x83   : > { %2222 = shalt.err (!%p2219_p6)
}
  0x84   : > { %s2223_s15 = scalar_lea.vmem %s433_s20, 16  ;;  %s2230_s18 = scalar_lea.vmem %s433_s20, 32 }
  0x85   : > { %p2224_p8 = scmp.ne.s32.totalorder %s433_s20, %s2223_s15  ;;  %p2231_p11 = scmp.lt.s32.totalorder %s433_s20, %s433_s20 }
  0x86   : > { %p2232_p4 = scmp.lt.s32.totalorder %s2230_s18, %s2223_s15 }
  0x87   : > { %p2226_p9 = pnand %p2224_p8, %p2734_p7 }
  0x88   : > { %p2233_p3 = por %p2232_p4, %p2231_p11 }
  0x89   : > { %p2227_p10 = pneg %p2226_p9 }
  0x8b   : > { %p2234_p1 = pnand %p2233_p3, %p2227_p10 }
  0x8d   : > { %2237 = shalt.err (!%p2234_p1)
}
  0x8e   : > { %1978 = dma.hbm_to_vmem [thread:$0]  (!%p2718_p5), %s3275_s7, 16, %s433_s20, [#allocation18]  }
  0x8f   : > { %s2578_s27 = smov [#allocation20]   ;;  %s3276_s9 = sld [smem:[#allocation44_spill]] }
  0x90   : > { %s456_s14 = sshll.u32 %s2578_s27, 4  ;;  %s457_s14 = int_to_ptr.vmem [resolvable:$true] %s456_s14 }
  0x95   : > { %s2238_s11 = scalar_lea.hbm %s3276_s9, 16 }
  0x96   : > { %p2239_p12 = scmp.ne.s32.totalorder %s3276_s9, %s2238_s11  ;;  %p2245_p13 = scmp.lt.u32.totalorder %s2238_s11, %s3276_s9 }
  0x98   : > { %p2241_p1 = pnand %p2239_p12, %p2734_p7 }
  0x9a   : > { %p2242_p3 = pneg %p2241_p1 }
  0x9c   : > { %p2247_p0 = pnand %p2245_p13, %p2242_p3 }
  0x9e   : > { %2250 = shalt.err (!%p2247_p0)
}
  0x9f   : > { %s2251_s20 = scalar_lea.vmem %s457_s14, 16  ;;  %s2258_s1 = scalar_lea.vmem %s457_s14, 32 }
  0xa0   : > { %p2252_p2 = scmp.ne.s32.totalorder %s457_s14, %s2251_s20  ;;  %p2259_p9 = scmp.lt.s32.totalorder %s457_s14, %s457_s14 }
  0xa1   : > { %p2260_p10 = scmp.lt.s32.totalorder %s2258_s1, %s2251_s20 }
  0xa2   : > { %p2254_p6 = pnand %p2252_p2, %p2734_p7 }
  0xa3   : > { %p2261_p11 = por %p2260_p10, %p2259_p9 }
  0xa4   : > { %p2255_p8 = pneg %p2254_p6 }
  0xa6   : > { %p2262_p4 = pnand %p2261_p11, %p2255_p8 }
  0xa8   : > { %2265 = shalt.err (!%p2262_p4)
}
  0xa9   : > { %1984 = dma.hbm_to_vmem [thread:$0]  (!%p2718_p5), %s3276_s9, 16, %s457_s14, [#allocation21]  }
  0xaa   : > { %s1717_s17 = sadd.s32 4294967294, %s2570_s26   ;;  %s44_s19 = sadd.s32 1, %s2566_s25 }
  0xab   : > { %p46_p12 = scmp.ge.s32.totalorder %s44_s19, 2  ;;  %s51_s11 = sadd.s32 1, %s2558_s23 }
  0xac   : > { %p64_p1 = scmp.ne.s32.totalorder %s2554_s22, %s2550_s21  ;;  %p320_p3 = scmp.ne.s32.totalorder %s2558_s23, %s2554_s22 }
  0xad   : > { %s3311_s19 = smov (%p46_p12, %s44_s19), 0  ;;  %p3278_p13 = scmp.ne.s32.totalorder %s3268_s30, 0 }
  0xae   : > { %3277 = sst [smem:[#allocation34_spill]] %s3311_s19  ;;  %s3280_s28 = sadd.s32 4294967295, %s2570_s26  }
  0xaf   : > { %p2856_p0 = por %p3278_p13, %p64_p1  ;;  %p321_p2 = scmp.eq.s32.totalorder %s3280_s28, 1 }
  0xb0   : > { %s48_s14 = ssub.s32 %s2566_s25, %s3311_s19  ;;  %p327_p6 = scmp.eq.s32.totalorder %s1717_s17, 1 }
  0xb1   : > { %s3279_s12 = scalar_select %p2856_p0, 1, 0 }
  0xb2   : > { %p49_p8 = scmp.eq.s32.totalorder %s48_s14, 0  ;;  %p2864_p9 = por %p321_p2, %p320_p3 }
  0xb3   : > { %p2868_p10 = por %p327_p6, %p64_p1  ;;  %s3243_s20 = sshll.u32 %s2562_s24, 7 }
  0xb4   : > { %s3281_s15 = scalar_select %p2864_p9, 1, 0 }
  0xb5   : > { %s3282_s18 = scalar_select %p2868_p10, 1, 0 }
  0xb6   : > { %s2874_s1 = scalar_select %p49_p8, %s2558_s23, %s51_s11  }
  0xb7   : > { %s3283_s0 = sld [smem:[#allocation35_spill]]  ;;  %s2579_s17 = smov [#allocation5]  }
  0xb8   : > { %s349_s28 = sshll.u32 %s2579_s17, 4  ;;  %p3284_p11 = scmp.ne.s32.totalorder %s3269_s13, 0  ;;  %s350_s28 = int_to_ptr.vmem [resolvable:$true] %s349_s28 }
  0xb9   : > { %s2580_s11 = smov [#allocation10]  }
  0xba   : > { %p3285_p4 = pneg %p3284_p11  ;;  %s371_s29 = sshll.u32 %s2580_s11, 4  ;;  %s372_s29 = int_to_ptr.vmem [resolvable:$true] %s371_s29 }
  0xbc   : > { %p2888_p12 = pnand %p3285_p4, %p2856_p0 }
  0xbd   : > { %s2881_s6 = scalar_lea.hbm %s3283_s0, %s3243_s20  ;;  %s2271_s8 = scalar_lea.hbm %s3283_s0, 256 }
  0xbe   : > { %s2266_s27 = scalar_lea.hbm %s2881_s6, 128  ;;  %p2268_p3 = pneg %p2888_p12 }
  0xbf   : > { %p2267_p1 = scmp.ne.s32.totalorder %s2881_s6, %s2266_s27  ;;  %p2272_p6 = scmp.lt.u32.totalorder %s2881_s6, %s3283_s0 }
  0xc0   : > { %p2273_p8 = scmp.lt.u32.totalorder %s2271_s8, %s2266_s27  ;;  %p2275_p10 = scmp.lt.u32.totalorder %s2266_s27, %s2881_s6 }
  0xc1   : > { %p2269_p13 = pnand %p2268_p3, %p2267_p1 }
  0xc2   : > { %p2274_p4 = por %p2273_p8, %p2272_p6 }
  0xc3   : > { %p2270_p2 = pneg %p2269_p13 }
  0xc4   : > { %p2276_p9 = por %p2275_p10, %p2274_p4 }
  0xc6   : > { %p2277_p0 = pnand %p2276_p9, %p2270_p2 }
  0xc8   : > { %2280 = shalt.err (!%p2277_p0)
}
  0xc9   : > { %s2281_s11 = scalar_lea.vmem %s350_s28, 128  ;;  %p2289_p5 = scmp.lt.s32.totalorder %s350_s28, %s350_s28 }
  0xca   : > { %p2282_p11 = scmp.ne.s32.totalorder %s350_s28, %s2281_s11  ;;  %p2290_p7 = scmp.lt.s32.totalorder %s2281_s11, %s2281_s11 }
  0xcc   : > { %p2284_p1 = pnand %p2282_p11, %p2268_p3  ;;  %p2291_p6 = por %p2290_p7, %p2289_p5 }
  0xce   : > { %p2285_p13 = pneg %p2284_p1 }
  0xd0   : > { %p2292_p8 = pnand %p2291_p6, %p2285_p13 }
  0xd2   : > { %2295 = shalt.err (!%p2292_p8)
}
  0xd3   : > { %1957 = dma.hbm_to_vmem [thread:$0]  (!%p2888_p12), %s2881_s6, 128, %s350_s28, [#allocation6]  }
  0xd4   : > { %s3287_s2 = sld [smem:[#allocation37_spill]]  ;;  %p3288_p9 = scmp.ne.s32.totalorder %s3272_s10, 0 }
  0xda   : > { %s2296_s8 = scalar_lea.hbm %s3287_s2, 16 }
  0xdb   : > { %p2297_p0 = scmp.ne.s32.totalorder %s3287_s2, %s2296_s8  ;;  %p2303_p5 = scmp.lt.u32.totalorder %s2296_s8, %s3287_s2 }
  0xdd   : > { %p2299_p10 = pnand %p2297_p0, %p3288_p9 }
  0xdf   : > { %p2300_p11 = pneg %p2299_p10 }
  0xe1   : > { %p2305_p7 = pnand %p2303_p5, %p2300_p11 }
  0xe3   : > { %2308 = shalt.err (!%p2305_p7)
}
  0xe4   : > { %s2309_s14 = scalar_lea.vmem %s372_s29, 16  ;;  %s2316_s6 = scalar_lea.vmem %s372_s29, 32 }
  0xe5   : > { %p2310_p12 = scmp.ne.s32.totalorder %s372_s29, %s2309_s14  ;;  %p2317_p4 = scmp.lt.s32.totalorder %s372_s29, %s372_s29 }
  0xe6   : > { %p2318_p1 = scmp.lt.s32.totalorder %s2316_s6, %s2309_s14 }
  0xe7   : > { %p2312_p3 = pnand %p2310_p12, %p3288_p9 }
  0xe8   : > { %p2319_p13 = por %p2318_p1, %p2317_p4 }
  0xe9   : > { %p2313_p2 = pneg %p2312_p3 }
  0xeb   : > { %p2320_p6 = pnand %p2319_p13, %p2313_p2 }
  0xed   : > { %2323 = shalt.err (!%p2320_p6)
}
  0xee   : > { %p3289_p8 = scmp.ne.s32.totalorder %s3270_s16, 0  ;;  %s2581_s5 = smov [#allocation13]  }
  0xef   : > { %s394_s8 = sshll.u32 %s2581_s5, 4  ;;  %s2582_s20 = smov [#allocation16]   ;;  %s395_s8 = int_to_ptr.vmem [resolvable:$true] %s394_s8 }
  0xf0   : > { %1963 = dma.hbm_to_vmem [thread:$0]  (!%p3289_p8), %s3287_s2, 16, %s372_s29, [#allocation9]  }
  0xf1   : > { %s421_s27 = sshll.u32 %s2582_s20, 4  ;;  %s3290_s4 = sld [smem:[#allocation39_spill]]  ;;  %s422_s27 = int_to_ptr.vmem [resolvable:$true] %s421_s27 }
  0xf7   : > { %s2324_s0 = scalar_lea.hbm %s3290_s4, 256 }
  0xf8   : > { %p2325_p0 = scmp.ne.s32.totalorder %s3290_s4, %s2324_s0  ;;  %p2331_p5 = scmp.lt.u32.totalorder %s2324_s0, %s3290_s4 }
  0xfa   : > { %p2327_p10 = pnand %p2325_p0, %p3288_p9 }
  0xfc   : > { %p2328_p11 = pneg %p2327_p10 }
  0xfe   : > { %p2333_p7 = pnand %p2331_p5, %p2328_p11 }
 0x100   : > { %2336 = shalt.err (!%p2333_p7)
}
 0x101   : > { %s2337_s29 = scalar_lea.vmem %s395_s8, 256  ;;  %p2345_p4 = scmp.lt.s32.totalorder %s395_s8, %s395_s8 }
 0x102   : > { %p2338_p12 = scmp.ne.s32.totalorder %s395_s8, %s2337_s29  ;;  %p2346_p1 = scmp.lt.s32.totalorder %s2337_s29, %s2337_s29 }
 0x104   : > { %p2340_p3 = pnand %p2338_p12, %p3288_p9  ;;  %p2347_p13 = por %p2346_p1, %p2345_p4 }
 0x106   : > { %p2341_p2 = pneg %p2340_p3 }
 0x108   : > { %p2348_p6 = pnand %p2347_p13, %p2341_p2 }
 0x10a   : > { %2351 = shalt.err (!%p2348_p6)
}
 0x10b   : > { %s3291_s3 = smov 4   ;;  %s3292_s5 = smov 64  }
 0x10c   : > { %1969 = dma.hbm_to_vmem [thread:$0]  (!%p3289_p8), %s3290_s4, 256, %s395_s8, [#allocation12], %s3292_s5, %s3292_s5, %s3291_s3  }
 0x10d   : > { %s3293_s11 = sld [smem:[#allocation41_spill]] }
 0x113   : > { %s2352_s14 = scalar_lea.hbm %s3293_s11, 16 }
 0x114   : > { %p2353_p0 = scmp.ne.s32.totalorder %s3293_s11, %s2352_s14  ;;  %p2359_p5 = scmp.lt.u32.totalorder %s2352_s14, %s3293_s11 }
 0x116   : > { %p2355_p10 = pnand %p2353_p0, %p3288_p9 }
 0x118   : > { %p2356_p11 = pneg %p2355_p10 }
 0x11a   : > { %p2361_p7 = pnand %p2359_p5, %p2356_p11 }
 0x11c   : > { %2364 = shalt.err (!%p2361_p7)
}
 0x11d   : > { %s2365_s7 = scalar_lea.vmem %s422_s27, 16  ;;  %s2372_s8 = scalar_lea.vmem %s422_s27, 32 }
 0x11e   : > { %p2366_p12 = scmp.ne.s32.totalorder %s422_s27, %s2365_s7  ;;  %p2373_p4 = scmp.lt.s32.totalorder %s422_s27, %s422_s27 }
 0x11f   : > { %p2374_p1 = scmp.lt.s32.totalorder %s2372_s8, %s2365_s7 }
 0x120   : > { %p2368_p3 = pnand %p2366_p12, %p3288_p9 }
 0x121   : > { %p2375_p13 = por %p2374_p1, %p2373_p4 }
 0x122   : > { %p2369_p2 = pneg %p2368_p3 }
 0x124   : > { %p2376_p6 = pnand %p2375_p13, %p2369_p2 }
 0x126   : > { %2379 = shalt.err (!%p2376_p6)
}
 0x127   : > { %1975 = dma.hbm_to_vmem [thread:$0]  (!%p3289_p8), %s3293_s11, 16, %s422_s27, [#allocation15]  }
 0x128   : > { %s2583_s2 = smov [#allocation19]   ;;  %s2584_s14 = smov [#allocation22]  }
 0x129   : > { %s442_s17 = sshll.u32 %s2583_s2, 4  ;;  %s466_s6 = sshll.u32 %s2584_s14, 4  ;;  %s443_s17 = int_to_ptr.vmem [resolvable:$true] %s442_s17  ;;  %s467_s6 = int_to_ptr.vmem [resolvable:$true] %s466_s6 }
 0x12a   : > { %s3294_s4 = sld [smem:[#allocation43_spill]] }
 0x130   : > { %s2380_s9 = scalar_lea.hbm %s3294_s4, 256 }
 0x131   : > { %p2381_p0 = scmp.ne.s32.totalorder %s3294_s4, %s2380_s9  ;;  %p2387_p5 = scmp.lt.u32.totalorder %s2380_s9, %s3294_s4 }
 0x133   : > { %p2383_p10 = pnand %p2381_p0, %p3288_p9 }
 0x135   : > { %p2384_p11 = pneg %p2383_p10 }
 0x137   : > { %p2389_p7 = pnand %p2387_p5, %p2384_p11 }
 0x139   : > { %2392 = shalt.err (!%p2389_p7)
}
 0x13a   : > { %s2393_s27 = scalar_lea.vmem %s443_s17, 256  ;;  %p2401_p4 = scmp.lt.s32.totalorder %s443_s17, %s443_s17 }
 0x13b   : > { %p2394_p12 = scmp.ne.s32.totalorder %s443_s17, %s2393_s27  ;;  %p2402_p1 = scmp.lt.s32.totalorder %s2393_s27, %s2393_s27 }
 0x13d   : > { %p2396_p3 = pnand %p2394_p12, %p3288_p9  ;;  %p2403_p13 = por %p2402_p1, %p2401_p4 }
 0x13f   : > { %p2397_p2 = pneg %p2396_p3 }
 0x141   : > { %p2404_p6 = pnand %p2403_p13, %p2397_p2 }
 0x143   : > { %2407 = shalt.err (!%p2404_p6)
}
 0x144   : > { %1981 = dma.hbm_to_vmem [thread:$0]  (!%p3289_p8), %s3294_s4, 256, %s443_s17, [#allocation18], %s3292_s5, %s3292_s5, %s3291_s3  }
 0x145   : > { %s3295_s14 = sld [smem:[#allocation45_spill]] }
 0x14b   : > { %s2408_s28 = scalar_lea.hbm %s3295_s14, 256 }
 0x14c   : > { %p2409_p0 = scmp.ne.s32.totalorder %s3295_s14, %s2408_s28  ;;  %p2415_p5 = scmp.lt.u32.totalorder %s2408_s28, %s3295_s14 }
 0x14e   : > { %p2411_p10 = pnand %p2409_p0, %p3288_p9 }
 0x150   : > { %p2412_p11 = pneg %p2411_p10 }
 0x152   : > { %p2417_p7 = pnand %p2415_p5, %p2412_p11 }
 0x154   : > { %2420 = shalt.err (!%p2417_p7)
}
 0x155   : > { %s2421_s27 = scalar_lea.vmem %s467_s6, 256  ;;  %p2429_p4 = scmp.lt.s32.totalorder %s467_s6, %s467_s6 }
 0x156   : > { %p2422_p12 = scmp.ne.s32.totalorder %s467_s6, %s2421_s27  ;;  %p2430_p1 = scmp.lt.s32.totalorder %s2421_s27, %s2421_s27 }
 0x158   : > { %p2424_p3 = pnand %p2422_p12, %p3288_p9  ;;  %p2431_p13 = por %p2430_p1, %p2429_p4 }
 0x15a   : > { %p2425_p2 = pneg %p2424_p3 }
 0x15c   : > { %p2432_p6 = pnand %p2431_p13, %p2425_p2 }
 0x15e   : > { %2435 = shalt.err (!%p2432_p6)
}
 0x15f   : > { %1987 = dma.hbm_to_vmem [thread:$0]  (!%p3289_p8), %s3295_s14, 256, %s467_s6, [#allocation21], %s3292_s5, %s3292_s5, %s3291_s3  }
 0x160   : > { %s2585_s9 = smov [#allocation23]   ;;  %s3296_s29 = sld [smem:[#allocation46_spill]] }
 0x161   : > { %s480_s20 = sshll.u32 %s2585_s9, 4  ;;  %s481_s20 = int_to_ptr.vmem [resolvable:$true] %s480_s20 }
 0x166   : > { %s2436_s7 = scalar_lea.hbm %s3296_s29, 16 }
 0x167   : > { %p2437_p0 = scmp.ne.s32.totalorder %s3296_s29, %s2436_s7  ;;  %p2443_p5 = scmp.lt.u32.totalorder %s2436_s7, %s3296_s29 }
 0x169   : > { %p2439_p10 = pnand %p2437_p0, %p3288_p9 }
 0x16b   : > { %p2440_p11 = pneg %p2439_p10 }
 0x16d   : > { %p2445_p7 = pnand %p2443_p5, %p2440_p11 }
 0x16f   : > { %2448 = shalt.err (!%p2445_p7)
}
 0x170   : > { %s2449_s3 = scalar_lea.vmem %s481_s20, 16  ;;  %s2456_s5 = scalar_lea.vmem %s481_s20, 32 }
 0x171   : > { %p2450_p12 = scmp.ne.s32.totalorder %s481_s20, %s2449_s3  ;;  %p2457_p4 = scmp.lt.s32.totalorder %s481_s20, %s481_s20 }
 0x172   : > { %p2458_p1 = scmp.lt.s32.totalorder %s2456_s5, %s2449_s3 }
 0x173   : > { %p2452_p3 = pnand %p2450_p12, %p3288_p9 }
 0x174   : > { %p2459_p13 = por %p2458_p1, %p2457_p4 }
 0x175   : > { %p2453_p2 = pneg %p2452_p3 }
 0x177   : > { %p2460_p6 = pnand %p2459_p13, %p2453_p2 }
 0x179   : > { %2463 = shalt.err (!%p2460_p6)
}
 0x17a   : > { %1990 = dma.hbm_to_vmem [thread:$0]  (!%p3289_p8), %s3296_s29, 16, %s481_s20, [#allocation24]  }
 0x17b   : > { %p3297_p0 = scmp.ne.s32.totalorder %s3269_s13, 0 }
 0x17c   : > { %p3298_p10 = scmp.ne.s32.totalorder (!%p3297_p0), %s3279_s12, 0 }
 0x17d   : > { %493 = sbr.rel (%p3297_p0) target bundleno = 2792 (0xae8), region = 68 }
 0x184   : > { %2517 = dma.done.wait (%p3298_p10), [#allocation6], 128  }
 0x185   : > { %2519 = vsyncadd (%p3298_p10), [#allocation6], 4294967168  ;;  %p3299_p9 = scmp.ne.s32.totalorder %s3268_s30, 0 }
 0x187   : > { %2521 = dma.done.wait (%p3299_p9), [#allocation9], 32  }
 0x188   : > { %2523 = vsyncadd (%p3299_p9), [#allocation9], 4294967264 }
 0x189   : > { %2525 = dma.done.wait (%p3299_p9), [#allocation12], 512  }
 0x18a   : > { %2527 = vsyncadd (%p3299_p9), [#allocation12], 4294966784 }
 0x18b   : > { %2529 = dma.done.wait (%p3299_p9), [#allocation15], 272  }
 0x18c   : > { %2531 = vsyncadd (%p3299_p9), [#allocation15], 4294967024 }
 0x18d   : > { %2533 = dma.done.wait (%p3299_p9), [#allocation18], 272  }
 0x18e   : > { %2535 = vsyncadd (%p3299_p9), [#allocation18], 4294967024 }
 0x18f   : > { %2537 = dma.done.wait (%p3299_p9), [#allocation21], 272  }
 0x190   : > { %2539 = vsyncadd (%p3299_p9), [#allocation21], 4294967024 }
 0x191   : > { %2541 = dma.done.wait (%p3299_p9), [#allocation24], 16  }
 0x192   : > { %2543 = vsyncadd (%p3299_p9), [#allocation24], 4294967280  ;;  %vm582_vm0 = vcmask 261120   ;;  %v3060_v0 = vld [vmem:[#allocation5] sm:$0xff]  ;;  %v2094_v13 = vld [vmem:[#allocation11] sm:$0xff]   ;;  %v2586_v14 = vmov 0.0  }
 0x193   : > { %v583_v1 = vsel %vm582_vm0, %v3060_v0, 0.0  ;;  %v2092_v12 = vld [vmem:[#allocation13] sm:$0xff]   ;;  %1818 = vmatprep.subr.bf16.mxu0 %v2586_v14  ;;  %1826 = vmatprep.subr.bf16.mxu1 %v2586_v14  ;;  %v2093_v15 = vld [vmem:[#allocation13 + $0x8] sm:$0xff]   ;;  %vm2587_vm1 = vmmov 0   ;;  %v2095_v16 = vld [vmem:[#allocation11 + $0x8] sm:$0xff]   ;;  %vm672_vm2 = vcmask 60416  }
 0x194   : > { %584 = vadd.xlane.f32.xlu0 %v583_v1  ;;  %1819 = vmatpush3.bf16.msra.mxu0 %v2092_v12  ;;  %v1744_v24 = vld [vmem:[#allocation8] ss:$0 sm:$0xff]  ;;  %v1745_v26 = vld [vmem:[#allocation10] ss:$0 sm:$0xff]  ;;  %s2588_s4 = smov 120   ;;  %s2589_s10 = smov 112  }
 0x195   : > { %1827 = vmatpush3.bf16.msra.mxu1 %v2094_v13  ;;  %1820 = vmatprep.subr.bf16.mxu0 %v2586_v14  ;;  %s2590_s30 = smov 104   ;;  %vm816_vm3 = vcmask 64512   ;;  %s2591_s13 = smov 96   ;;  %vm877_vm4 = vcmask 1043456   ;;  %vm1044_vm5 = vcmask 126016   ;;  %vm1163_vm6 = vcmask 191616  }
 0x196   : > { %1822 = vmatprep.mubr.msk.bf16.mxu0 %vm2587_vm1, %v2586_v14  ;;  %1828 = vmatprep.subr.bf16.mxu1 %v2586_v14  ;;  %s2592_s16 = smov 88   ;;  %s2593_s12 = smov 80   ;;  %vm1282_vm7 = vcmask 257216  }
 0x197   : > { %1830 = vmatprep.mubr.msk.bf16.mxu1 %vm2587_vm1, %v2586_v14  ;;  %s2594_s19 = smov 72   ;;  %s2595_s9 = smov 8  }
 0x198   : > { %727 = vadd.xlane.f32.xlu0 %v583_v1  ;;  %1821 = vmatpush3.bf16.msra.mxu0 %v2093_v15  ;;  %s2596_s20 = smov 16   ;;  %s2597_s2 = smov 24  }
 0x199   : > { %1834 = vmatprep.subr.bf16.mxu0 %v2586_v14  ;;  %1829 = vmatpush3.bf16.msra.mxu1 %v2095_v16  ;;  %s571_s28 = sand.u32 1, %s2554_s22   ;;  %s3300_s27 = sshll.u32 %s2562_s24, 7 }
 0x19a   : > { %1840 = vmatprep.subr.bf16.mxu1 %v2586_v14  ;;  %s1743_s7 = sshll.u32 %s571_s28, 3  ;;  %s3301_s6 = sld [smem:[#allocation47_spill]] }
 0x19b   : > { %s573_s8 = scalar_lea.vmem [#allocation25], %s1743_s7  ;;  %p3302_p11 = scmp.ne.s32.totalorder %s3281_s15, 0 }
 0x19c   : > { %s1533_s0 = sshll.u32 %s573_s8, 4  ;;  %s3171_s0 = int_to_ptr.vmem [resolvable:$true] %s1533_s0 }
 0x1a0   : > { %s3169_s17 = scalar_lea.hbm %s3301_s6, %s3300_s27 }
 0x221   : > { %v585_v2 = vpop.xlane.xlu0 %584 }
 0x222   : > { %v587_v3 = vmul.f32 0.03125, %v585_v2 }
 0x224   : > { %v588_v4 = vsub.f32 %v3060_v0, %v587_v3 }
 0x225   : > { %v728_v5 = vpop.xlane.xlu0 %727 }
 0x226   : > { %v730_v6 = vmul.f32 0.03125, %v728_v5  ;;  %v589_v7 = vmul.f32 %v588_v4, %v588_v4 }
 0x228   : > { %v731_v8 = vsub.f32 %v3060_v0, %v730_v6  ;;  %v590_v9 = vsel %vm582_vm0, %v589_v7, 0.0 }
 0x229   : > { %591 = vadd.xlane.f32.xlu1 %v590_v9 }
 0x22a   : > { %v732_v10 = vmul.f32 %v731_v8, %v731_v8 }
 0x22c   : > { %v733_v11 = vsel %vm582_vm0, %v732_v10, 0.0 }
 0x22d   : > { %734 = vadd.xlane.f32.xlu1 %v733_v11 }
 0x2b6   : > { %v592_v17 = vpop.xlane.xlu1 %591 }
 0x2b7   : > { %v593_v18 = vmul.f32 0.03125, %v592_v17 }
 0x2b9   : > { %v594_v19 = vadd.f32 1e-05, %v593_v18 }
 0x2ba   : > { %v735_v20 = vpop.xlane.xlu1 %734 }
 0x2bb   : > { %2102 = vrsqrt.f32 %v594_v19  ;;  %v736_v21 = vmul.f32 0.03125, %v735_v20 }
 0x2bd   : > { %v737_v22 = vadd.f32 1e-05, %v736_v21 }
 0x2bf   : > { %2104 = vrsqrt.f32 %v737_v22 }
 0x2c5   : > { %v2103_v23 = vpop.eup %2102 }
 0x2c6   : > { %v596_v25 = vmul.f32 %v2103_v23, %v588_v4 }
 0x2c8   : > { %v603_v27 = vmul.f32 %v1744_v24, %v596_v25 }
 0x2c9   : > { %v2105_v28 = vpop.eup %2104 }
 0x2ca   : > { %v610_v29 = vadd.f32 %v1745_v26, %v603_v27  ;;  %v739_v30 = vmul.f32 %v2105_v28, %v731_v8 }
 0x2cc   : > { %v611_v31 = vpack.c.bf16 %v610_v29, %v610_v29  ;;  %v746_v32 = vmul.f32 %v1744_v24, %v739_v30 }
 0x2ce   : > { %1823 = vmatmul.mubr.msk.bf16.vlgmr.msra.gmra.mrb[0].mxu0 %vm582_vm0, %v611_v31  ;;  %v753_v33 = vadd.f32 %v1745_v26, %v746_v32 }
 0x2cf   : > { %1836 = vmatprep.mubr.msk.bf16.mxu0 %vm2587_vm1, %v2586_v14 }
 0x2d0   : > { %v754_v34 = vpack.c.bf16 %v753_v33, %v753_v33 }
 0x2d2   : > { %1831 = vmatmul.mubr.msk.bf16.vlgmr.msra.gmra.mrb[0].mxu1 %vm582_vm0, %v754_v34 }
 0x2d3   : > { %1842 = vmatprep.mubr.msk.bf16.mxu1 %vm2587_vm1, %v2586_v14 }
 0x3a1   : > { %v665_v35 = vpop.f32.mrb[0].mxu0 }
 0x3a2   : > { %v3084_v36 = vpack.c.bf16 %v665_v35, %v665_v35  ;;  %v1824_v37 = vpop.f32.mrb[1].mxu0 }
 0x3a3   : > { %v668_v38 = vpop.f32.mrb[2].mxu0 }
 0x3a4   : > { %673 = vst.msk [vmem:[#allocation2] sm:$0xf] %vm672_vm2, %v3084_v36  ;;  %681 = vrot.lane.b32.xlu0 %v3084_v36, %s2588_s4  ;;  %v1825_v39 = vpop.f32.mrb[3].mxu0  ;;  %694 = vrot.lane.b32.xlu1 %v3084_v36, %s2589_s10 }
 0x3a5   : > { %v808_v40 = vpop.f32.mrb[0].mxu1 }
 0x3a6   : > { %v814_v41 = vpack.c.bf16 %v808_v40, %v808_v40  ;;  %v1832_v42 = vpop.f32.mrb[1].mxu1 }
 0x3a7   : > { %v811_v43 = vpop.f32.mrb[2].mxu1 }
 0x3a8   : > { %707 = vrot.lane.b32.xlu1 %v3084_v36, %s2590_s30  ;;  %1048 = vrot.lane.b32.xlu0 %v814_v41, %s2589_s10  ;;  %v1833_v44 = vpop.f32.mrb[3].mxu1  ;;  %s2464_s10 = scalar_lea.vmem %s3171_s0, 128 }
 0x3a9   : > { %p2465_p8 = scmp.ne.s32.totalorder %s3171_s0, %s2464_s10 }
 0x3ab   : > { %v815_v45 = vld [vmem:[#allocation2] sm:$0xf]  ;;  %p2466_p5 = pnand %p2465_p8, %p3302_p11 }
 0x3ac   : > { %677 = vrot.lane.b32.xlu0 %v3084_v36, %s2591_s13  ;;  %929 = vrot.lane.b32.xlu1 %v814_v41, %s2588_s4  ;;  %v821_v46 = vsel %vm816_vm3, %v815_v45, 0  ;;  %s1519_s4 = scalar_lea.sflag [#allocation7], %s571_s28 }
 0x3ad   : > { %1835 = vmatpush3.bf16.xpose.msra.mxu0 %v821_v46  ;;  %p2467_p7 = pneg %p2466_p5 }
 0x3ae   : > { %1846 = vmatprep.subr.bf16.mxu0 %v2586_v14 }
 0x3b0   : > { %1167 = vrot.lane.b32.xlu1 %v814_v41, %s2590_s30  ;;  %s2598_s30 = smov [#allocation25]  }
 0x3b1   : > { %s2468_s24 = sshll.u32 %s2598_s30, 4  ;;  %s2469_s24 = int_to_ptr.vmem [resolvable:$false] %s2468_s24 }
 0x3b2   : > { %s2470_s13 = scalar_lea.vmem %s2469_s24, 256  ;;  %p2471_p12 = scmp.lt.s32.totalorder %s3171_s0, %s2469_s24 }
 0x3b3   : > { %p2472_p3 = scmp.lt.s32.totalorder %s2470_s13, %s2464_s10 }
 0x3b4   : > { %688 = vrot.lane.b32.xlu1 %v3084_v36, %s2592_s16  ;;  %1837 = vmatmul.mubr.msk.bf16.vlgmr.msra.gmra.mrb[4].mxu0 %vm816_vm3, %v814_v41 }
 0x3b5   : > { %1848 = vmatprep.mubr.msk.bf16.mxu0 %vm2587_vm1, %v2586_v14  ;;  %p2473_p2 = por %p2472_p3, %p2471_p12 }
 0x3b7   : > { %p2474_p4 = pnand %p2473_p2, %p2467_p7 }
 0x416   : > { %v695_v47 = vpop.permute.xlu1 %694  ;;  %v682_v48 = vpop.permute.xlu0 %681 }
 0x417   : > { %700 = vst.msk [vmem:[#allocation2 + $0x8] sm:$0xf] %vm672_vm2, %v695_v47  ;;  %687 = vst.msk [vmem:[#allocation2 + $0x4] sm:$0xf] %vm672_vm2, %v682_v48 }
 0x41a   : > { %v708_v49 = vpop.permute.xlu1 %707  ;;  %v1049_v50 = vpop.permute.xlu0 %1048 }
 0x41b   : > { %713 = vst.msk [vmem:[#allocation2 + $0xc] sm:$0xf] %vm672_vm2, %v708_v49 }
 0x41e   : > { %v930_v51 = vpop.permute.xlu1 %929  ;;  %v678_v52 = vpop.permute.xlu0 %677  ;;  %v927_v53 = vld [vmem:[#allocation2 + $0x4] sm:$0xf]  ;;  %v1047_v56 = vld [vmem:[#allocation2 + $0x8] sm:$0xf] }
 0x41f   : > { %680 = vst.msk [vmem:[#allocation3] sm:$0xf] %vm672_vm2, %v678_v52  ;;  %v935_v54 = vsel %vm816_vm3, %v927_v53, 0  ;;  %v1054_v60 = vsel %vm816_vm3, %v1047_v56, 0 }
 0x420   : > { %1847 = vmatpush3.bf16.xpose.msra.mxu0 %v935_v54 }
 0x421   : > { %1858 = vmatprep.subr.bf16.mxu0 %v2586_v14 }
 0x422   : > { %v1168_v55 = vpop.permute.xlu1 %1167  ;;  %v1166_v61 = vld [vmem:[#allocation2 + $0xc] sm:$0xf] }
 0x423   : > { %v1173_v62 = vsel %vm816_vm3, %v1166_v61, 0 }
 0x426   : > { %v689_v57 = vpop.permute.xlu1 %688  ;;  %v873_v58 = vld [vmem:[#allocation3] sm:$0xf] }
 0x427   : > { %693 = vst.msk [vmem:[#allocation3 + $0x4] sm:$0xf] %vm672_vm2, %v689_v57  ;;  %1849 = vmatmul.mubr.msk.bf16.vlgmr.msra.gmra.mrb[8].mxu0 %vm816_vm3, %v930_v51  ;;  %v879_v59 = vsel %vm877_vm4, %v873_v58, 0 }
 0x428   : > { %1841 = vmatpush3.bf16.msra.mxu1 %v879_v59  ;;  %1859 = vmatpush3.bf16.xpose.msra.mxu0 %v1054_v60 }
 0x429   : > { %1860 = vmatprep.mubr.msk.bf16.mxu0 %vm2587_vm1, %v2586_v14  ;;  %1870 = vmatprep.subr.bf16.mxu0 %v2586_v14 }
 0x42a   : > { %1852 = vmatprep.subr.bf16.mxu1 %v2586_v14 }
 0x42e   : > { %v988_v25 = vld [vmem:[#allocation3 + $0x4] sm:$0xf] }
 0x42f   : > { %1861 = vmatmul.mubr.msk.bf16.vlgmr.msra.gmra.mrb[12].mxu0 %vm816_vm3, %v1049_v50  ;;  %v993_v27 = vsel %vm877_vm4, %v988_v25, 0 }
 0x430   : > { %1871 = vmatpush3.bf16.xpose.msra.mxu0 %v1173_v62  ;;  %1872 = vmatprep.mubr.msk.bf16.mxu0 %vm2587_vm1, %v2586_v14 }
 0x431   : > { %1882 = vmatprep.subr.bf16.mxu0 %v2586_v14 }
 0x437   : > { %1873 = vmatmul.mubr.msk.bf16.vlgmr.msra.gmra.mrb[16].mxu0 %vm816_vm3, %v1168_v55 }
 0x438   : > { %1886 = vmatprep.mubr.msk.bf16.mxu0 %vm2587_vm1, %v2586_v14 }
 0x487   : > { %v857_v63 = vpop.f32.mrb[4].mxu0 }
 0x488   : > { %v1838_v1 = vpop.f32.mrb[5].mxu0  ;;  %v863_v2 = vsel %vm816_vm3, %v857_v63, -inf }
 0x489   : > { %864 = vmax.xlane.f32.xlu0 %v863_v2  ;;  %v860_v3 = vpop.f32.mrb[6].mxu0 }
 0x48a   : > { %v1839_v4 = vpop.f32.mrb[7].mxu0 }
 0x4fa   : > { %v971_v5 = vpop.f32.mrb[8].mxu0 }
 0x4fb   : > { %v1850_v6 = vpop.f32.mrb[9].mxu0  ;;  %v977_v7 = vsel %vm816_vm3, %v971_v5, -inf }
 0x4fc   : > { %978 = vmax.xlane.f32.xlu1 %v977_v7  ;;  %v974_v8 = vpop.f32.mrb[10].mxu0 }
 0x4fd   : > { %v1851_v9 = vpop.f32.mrb[11].mxu0 }
 0x502   : > { %v1090_v10 = vpop.f32.mrb[12].mxu0 }
 0x503   : > { %v1862_v11 = vpop.f32.mrb[13].mxu0  ;;  %v1096_v12 = vsel %vm816_vm3, %v1090_v10, -inf }
 0x504   : > { %1097 = vmax.xlane.f32.xlu0 %v1096_v12  ;;  %v1093_v13 = vpop.f32.mrb[14].mxu0 }
 0x505   : > { %v1863_v15 = vpop.f32.mrb[15].mxu0 }
 0x506   : > { %v2097_v15 = vld [vmem:[#allocation14 + $0x8] sm:$0xff]  }
 0x50a   : > { %v1209_v16 = vpop.f32.mrb[16].mxu0 }
 0x50b   : > { %v1874_v17 = vpop.f32.mrb[17].mxu0  ;;  %v1215_v18 = vsel %vm816_vm3, %v1209_v16, -inf }
 0x50c   : > { %1216 = vmax.xlane.f32.xlu1 %v1215_v18  ;;  %v1212_v19 = vpop.f32.mrb[18].mxu0 }
 0x50d   : > { %v1875_v20 = vpop.f32.mrb[19].mxu0 }
 0x516   : > { %v865_v21 = vpop.xlane.xlu0 %864 }
 0x517   : > { %v866_v22 = vsub.f32 %v857_v63, %v865_v21 }
 0x519   : > { %v867_v23 = vmul.f32 1.442695, %v866_v22 }
 0x51a   : > { %701 = vrot.lane.b32.xlu0 %v3084_v36, %s2593_s12 }
 0x51b   : > { %2106 = vpow2.f32 %v867_v23 }
 0x51d   : > { %714 = vrot.lane.b32.xlu1 %v3084_v36, %s2594_s19 }
 0x525   : > { %v2107_v24 = vpop.eup %2106 }
 0x526   : > { %v872_v26 = vpack.c.bf16 %v2107_v24, %v2107_v24  ;;  %v869_v52 = vsel %vm816_vm3, %v2107_v24, 0.0 }
 0x528   : > { %1843 = vmatmul.mubr.msk.bf16.vlgmr.msra.gmra.mrb[4].mxu1 %vm816_vm3, %v872_v26 }
 0x529   : > { %1853 = vmatpush3.bf16.msra.mxu1 %v993_v27  ;;  %1854 = vmatprep.mubr.msk.bf16.mxu1 %vm2587_vm1, %v2586_v14 }
 0x52a   : > { %1864 = vmatprep.subr.bf16.mxu1 %v2586_v14 }
 0x589   : > { %v979_v28 = vpop.xlane.xlu1 %978 }
 0x58a   : > { %v980_v29 = vsub.f32 %v971_v5, %v979_v28 }
 0x58c   : > { %v981_v30 = vmul.f32 1.442695, %v980_v29 }
 0x58e   : > { %2108 = vpow2.f32 %v981_v30 }
 0x591   : > { %v1098_v31 = vpop.xlane.xlu0 %1097 }
 0x592   : > { %v1099_v32 = vsub.f32 %v1090_v10, %v1098_v31  ;;  %v2096_v10 = vld [vmem:[#allocation14] sm:$0xff]  }
 0x593   : > { %1883 = vmatpush3.bf16.msra.mxu0 %v2096_v10 }
 0x594   : > { %v1100_v33 = vmul.f32 1.442695, %v1099_v32  ;;  %1884 = vmatprep.subr.bf16.mxu0 %v2586_v14 }
 0x595   : > { %v702_v34 = vpop.permute.xlu0 %701 }
 0x596   : > { %2110 = vpow2.f32 %v1100_v33  ;;  %706 = vst.msk [vmem:[#allocation3 + $0x8] sm:$0xf] %vm672_vm2, %v702_v34 }
 0x597   : > { %1885 = vmatpush3.bf16.msra.mxu0 %v2097_v15 }
 0x598   : > { %v2109_v35 = vpop.eup %2108  ;;  %1898 = vmatprep.subr.bf16.mxu0 %v2586_v14 }
 0x599   : > { %v1217_v36 = vpop.xlane.xlu1 %1216  ;;  %v983_v37 = vsel %vm816_vm3, %v2109_v35, 0.0  ;;  %v986_v38 = vpack.c.bf16 %v2109_v35, %v2109_v35 }
 0x59a   : > { %v1218_v39 = vsub.f32 %v1209_v16, %v1217_v36  ;;  %984 = vadd.xlane.f32.xlu0 %v983_v37 }
 0x59b   : > { %1855 = vmatmul.mubr.msk.bf16.vlgmr.msra.gmra.mrb[8].mxu1 %vm816_vm3, %v986_v38 }
 0x59c   : > { %v1219_v40 = vmul.f32 1.442695, %v1218_v39  ;;  %1866 = vmatprep.mubr.msk.bf16.mxu1 %vm2587_vm1, %v2586_v14 }
 0x59d   : > { %v715_v41 = vpop.permute.xlu1 %714  ;;  %v1107_v42 = vld [vmem:[#allocation3 + $0x8] sm:$0xf] }
 0x59e   : > { %2112 = vpow2.f32 %v1219_v40  ;;  %719 = vst.msk [vmem:[#allocation3 + $0xc] sm:$0xf] %vm672_vm2, %v715_v41  ;;  %v1112_v43 = vsel %vm877_vm4, %v1107_v42, 0  ;;  %v2098_v40 = vld [vmem:[#allocation19] sm:$0xff]   ;;  %v2099_v41 = vld [vmem:[#allocation19 + $0x8] sm:$0xff]  }
 0x59f   : > { %1865 = vmatpush3.bf16.msra.mxu1 %v1112_v43 }
 0x5a0   : > { %v2111_v44 = vpop.eup %2110  ;;  %1876 = vmatprep.subr.bf16.mxu1 %v2586_v14 }
 0x5a1   : > { %v1102_v45 = vsel %vm816_vm3, %v2111_v44, 0.0  ;;  %v1105_v46 = vpack.c.bf16 %v2111_v44, %v2111_v44 }
 0x5a2   : > { %1103 = vadd.xlane.f32.xlu1 %v1102_v45  ;;  %v1769_v45 = vld [vmem:[#allocation16] ss:$0 sm:$0xff] }
 0x5a3   : > { %1867 = vmatmul.mubr.msk.bf16.vlgmr.msra.gmra.mrb[12].mxu1 %vm816_vm3, %v1105_v46 }
 0x5a4   : > { %1878 = vmatprep.mubr.msk.bf16.mxu1 %vm2587_vm1, %v2586_v14 }
 0x5a5   : > { %v1226_v47 = vld [vmem:[#allocation3 + $0xc] sm:$0xf] }
 0x5a6   : > { %v1231_v48 = vsel %vm877_vm4, %v1226_v47, 0  ;;  %v1770_v47 = vld [vmem:[#allocation17] ss:$0 sm:$0xff] }
 0x5a7   : > { %1877 = vmatpush3.bf16.msra.mxu1 %v1231_v48 }
 0x5a8   : > { %v2113_v49 = vpop.eup %2112  ;;  %1890 = vmatprep.subr.bf16.mxu1 %v2586_v14 }
 0x5a9   : > { %v1221_v50 = vsel %vm816_vm3, %v2113_v49, 0.0  ;;  %v1224_v51 = vpack.c.bf16 %v2113_v49, %v2113_v49 }
 0x5aa   : > { %1222 = vadd.xlane.f32.xlu0 %v1221_v50 }
 0x5ab   : > { %1879 = vmatmul.mubr.msk.bf16.vlgmr.msra.gmra.mrb[16].mxu1 %vm816_vm3, %v1224_v51  ;;  %v2100_v51 = vld [vmem:[#allocation22] sm:$0xff]  }
 0x5ac   : > { %1894 = vmatprep.mubr.msk.bf16.mxu1 %vm2587_vm1, %v2586_v14  ;;  %1891 = vmatpush3.bf16.msra.mxu1 %v2098_v40 }
 0x5ad   : > { %1892 = vmatprep.subr.bf16.mxu1 %v2586_v14 }
 0x5ae   : > { %870 = vadd.xlane.f32.xlu0 %v869_v52  ;;  %v2101_v52 = vld [vmem:[#allocation22 + $0x8] sm:$0xff]  }
 0x5b0   : > { %1893 = vmatpush3.bf16.msra.mxu1 %v2099_v41 }
 0x5fb   : > { %v915_v53 = vpop.f32.mrb[4].mxu1 }
 0x5fc   : > { %v1844_v54 = vpop.f32.mrb[5].mxu1 }
 0x5fd   : > { %v918_v55 = vpop.f32.mrb[6].mxu1 }
 0x5fe   : > { %v1845_v56 = vpop.f32.mrb[7].mxu1 }
 0x627   : > { %v985_v57 = vpop.xlane.xlu0 %984 }
 0x62f   : > { %v1104_v63 = vpop.xlane.xlu1 %1103 }
 0x637   : > { %v1223_v58 = vpop.xlane.xlu0 %1222 }
 0x63b   : > { %v871_v59 = vpop.xlane.xlu0 %870 }
 0x63c   : > { %2114 = vrcp.f32 %v871_v59 }
 0x63d   : > { %2116 = vrcp.f32 %v985_v57 }
 0x63e   : > { %2118 = vrcp.f32 %v1104_v63 }
 0x63f   : > { %2120 = vrcp.f32 %v1223_v58 }
 0x646   : > { %v2115_v60 = vpop.eup %2114 }
 0x647   : > { %v922_v61 = vmul.f32 %v2115_v60, %v915_v53  ;;  %v2117_v1 = vpop.eup %2116  ;;  %v1771_v53 = vld [vmem:[#allocation20] ss:$0 sm:$0xff] }
 0x648   : > { %v2119_v8 = vpop.eup %2118 }
 0x649   : > { %v923_v62 = vpack.c.bf16 %v922_v61, %v922_v61  ;;  %v2121_v18 = vpop.eup %2120 }
 0x64b   : > { %925 = vst.msk [vmem:[#allocation4] sm:$0xf] %vm672_vm2, %v923_v62 }
 0x66e   : > { %v1029_v2 = vpop.f32.mrb[8].mxu1 }
 0x66f   : > { %v1036_v3 = vmul.f32 %v2117_v1, %v1029_v2  ;;  %v1856_v4 = vpop.f32.mrb[9].mxu1 }
 0x670   : > { %v1032_v5 = vpop.f32.mrb[10].mxu1 }
 0x671   : > { %v1784_v6 = vpack.c.bf16 %v1036_v3, %v1036_v3  ;;  %v1857_v7 = vpop.f32.mrb[11].mxu1  ;;  %v1775_v5 = vld [vmem:[#allocation23] ss:$0 sm:$0xff] }
 0x673   : > { %1041 = vrot.lane.b32.xlu0 %v1784_v6, %s2595_s9 }
 0x676   : > { %v1148_v9 = vpop.f32.mrb[12].mxu1 }
 0x677   : > { %v1155_v11 = vmul.f32 %v2119_v8, %v1148_v9  ;;  %v1868_v12 = vpop.f32.mrb[13].mxu1 }
 0x678   : > { %v1151_v13 = vpop.f32.mrb[14].mxu1 }
 0x679   : > { %v1785_v16 = vpack.c.bf16 %v1155_v11, %v1155_v11  ;;  %v1869_v17 = vpop.f32.mrb[15].mxu1 }
 0x67b   : > { %1160 = vrot.lane.b32.xlu1 %v1785_v16, %s2596_s20 }
 0x67e   : > { %v1267_v19 = vpop.f32.mrb[16].mxu1 }
 0x67f   : > { %v1274_v20 = vmul.f32 %v2121_v18, %v1267_v19  ;;  %v1880_v21 = vpop.f32.mrb[17].mxu1 }
 0x680   : > { %v1270_v22 = vpop.f32.mrb[18].mxu1 }
 0x681   : > { %v1786_v23 = vpack.c.bf16 %v1274_v20, %v1274_v20  ;;  %v1881_v24 = vpop.f32.mrb[19].mxu1 }
 0x683   : > { %1279 = vrot.lane.b32.xlu1 %v1786_v23, %s2597_s2 }
 0x6e5   : > { %v1042_v25 = vpop.permute.xlu0 %1041 }
 0x6e6   : > { %1045 = vst.msk [vmem:[#allocation4] sm:$0xf] %vm1044_vm5, %v1042_v25 }
 0x6ed   : > { %v1161_v26 = vpop.permute.xlu1 %1160 }
 0x6ee   : > { %1164 = vst.msk [vmem:[#allocation4] sm:$0xf] %vm1163_vm6, %v1161_v26 }
 0x6f5   : > { %v1280_v27 = vpop.permute.xlu1 %1279 }
 0x6f6   : > { %1283 = vst.msk [vmem:[#allocation4] sm:$0xf] %vm1282_vm7, %v1280_v27 }
 0x6fd   : > { %v1284_v28 = vld [vmem:[#allocation4] sm:$0xf] }
 0x6fe   : > { %1887 = vmatmul.mubr.msk.bf16.vlgmr.msra.gmra.mrb[20].mxu0 %vm582_vm0, %v1284_v28 }
 0x6ff   : > { %1902 = vmatprep.mubr.msk.bf16.mxu0 %vm2587_vm1, %v2586_v14  ;;  %1899 = vmatpush3.bf16.msra.mxu0 %v2100_v51 }
 0x700   : > { %1900 = vmatprep.subr.bf16.mxu0 %v2586_v14 }
 0x703   : > { %1901 = vmatpush3.bf16.msra.mxu0 %v2101_v52 }
 0x7d1   : > { %v1338_v29 = vpop.f32.mrb[20].mxu0 }
 0x7d2   : > { %v1339_v30 = vadd.f32 %v1338_v29, %v3060_v0  ;;  %v1888_v31 = vpop.f32.mrb[21].mxu0 }
 0x7d3   : > { %v1341_v32 = vpop.f32.mrb[22].mxu0 }
 0x7d4   : > { %v1889_v33 = vpop.f32.mrb[23].mxu0  ;;  %v1346_v34 = vsel %vm582_vm0, %v1339_v30, 0.0 }
 0x7d5   : > { %1347 = vadd.xlane.f32.xlu1 %v1346_v34 }
 0x862   : > { %v1348_v35 = vpop.xlane.xlu1 %1347 }
 0x863   : > { %v1349_v36 = vmul.f32 0.03125, %v1348_v35 }
 0x865   : > { %v1350_v37 = vsub.f32 %v1339_v30, %v1349_v36 }
 0x867   : > { %v1351_v38 = vmul.f32 %v1350_v37, %v1350_v37 }
 0x869   : > { %v1352_v39 = vsel %vm582_vm0, %v1351_v38, 0.0 }
 0x86a   : > { %1353 = vadd.xlane.f32.xlu0 %v1352_v39 }
 0x8f7   : > { %v1354_v0 = vpop.xlane.xlu0 %1353 }
 0x8f8   : > { %v1355_v42 = vmul.f32 0.03125, %v1354_v0 }
 0x8fa   : > { %v1356_v43 = vadd.f32 1e-05, %v1355_v42 }
 0x8fc   : > { %2122 = vrsqrt.f32 %v1356_v43 }
 0x906   : > { %v2123_v44 = vpop.eup %2122 }
 0x907   : > { %v1358_v46 = vmul.f32 %v2123_v44, %v1350_v37 }
 0x909   : > { %v1365_v48 = vmul.f32 %v1769_v45, %v1358_v46 }
 0x90b   : > { %v1372_v49 = vadd.f32 %v1770_v47, %v1365_v48 }
 0x90d   : > { %v1373_v50 = vpack.c.bf16 %v1372_v49, %v1372_v49 }
 0x90f   : > { %1895 = vmatmul.mubr.msk.bf16.vlgmr.msra.gmra.mrb[20].mxu1 %vm582_vm0, %v1373_v50 }
 0x9e2   : > { %v1434_v54 = vpop.f32.mrb[20].mxu1 }
 0x9e3   : > { %v1435_v55 = vadd.f32 %v1771_v53, %v1434_v54  ;;  %v1896_v56 = vpop.f32.mrb[21].mxu1 }
 0x9e4   : > { %v1437_v57 = vpop.f32.mrb[22].mxu1 }
 0x9e5   : > { %v1440_v58 = vmul.f32 %v1435_v55, %v1435_v55  ;;  %v1897_v59 = vpop.f32.mrb[23].mxu1 }
 0x9e7   : > { %v1441_v60 = vmul.f32 %v1440_v58, %v1435_v55 }
 0x9e9   : > { %v1442_v61 = vmul.f32 0.044715, %v1441_v60 }
 0x9eb   : > { %v1443_v62 = vadd.f32 %v1442_v61, %v1435_v55 }
 0x9ed   : > { %v1444_v63 = vmul.f32 0.7978846, %v1443_v62 }
 0x9ef   : > { %2124 = vtanh.f32 %v1444_v63 }
 0x9f9   : > { %v2125_v1 = vpop.eup %2124 }
 0x9fa   : > { %v1446_v2 = vadd.f32 1.0, %v2125_v1 }
 0x9fc   : > { %v1447_v3 = vmul.f32 0.5, %v1446_v2 }
 0x9fe   : > { %v1448_v14 = vmul.f32 %v1447_v3, %v1435_v55 }
 0xa00   : > { %v1449_v4 = vpack.c.bf16 %v1448_v14, %v1448_v14 }
 0xa02   : > { %1903 = vmatmul.mubr.msk.bf16.vlgmr.msra.gmra.mrb[24].mxu0 %vm582_vm0, %v1449_v4 }
 0xad5   : > { %v1510_v6 = vpop.f32.mrb[24].mxu0 }
 0xad6   : > { %v1511_v7 = vadd.f32 %v1775_v5, %v1510_v6  ;;  %v1904_v8 = vpop.f32.mrb[25].mxu0 }
 0xad7   : > { %v1513_v9 = vpop.f32.mrb[26].mxu0 }
 0xad8   : > { %v1516_v10 = vadd.f32 %v1511_v7, %v1339_v30  ;;  %v1905_v11 = vpop.f32.mrb[27].mxu0 }
 0xada   : > { %1517 = vst.msk [vmem:[%s573_s8] sm:$0xff] %vm582_vm0, %v1516_v10 }
 0xadb   : > { %2477 = shalt.err (!%p2474_p4)
}
 0xadc   : > { %s2478_s16 = scalar_lea.hbm %s3169_s17, 128  ;;  %s2482_s9 = scalar_lea.hbm %s3301_s6, 256 }
 0xadd   : > { %p2479_p1 = scmp.ne.s32.totalorder %s3169_s17, %s2478_s16  ;;  %p2483_p0 = scmp.lt.u32.totalorder %s3169_s17, %s3301_s6 }
 0xade   : > { %p2484_p10 = scmp.lt.u32.totalorder %s2482_s9, %s2478_s16  ;;  %p2486_p8 = scmp.lt.u32.totalorder %s2478_s16, %s3169_s17 }
 0xadf   : > { %p2480_p13 = pnand %p2479_p1, %p3302_p11 }
 0xae0   : > { %p2485_p9 = por %p2484_p10, %p2483_p0 }
 0xae1   : > { %p2481_p6 = pneg %p2480_p13 }
 0xae2   : > { %p2487_p5 = por %p2486_p8, %p2485_p9 }
 0xae4   : > { %p2488_p7 = pnand %p2487_p5, %p2481_p6 }
 0xae6   : > { %2491 = shalt.err (!%p2488_p7)
}
 0xae7   : > { %1952 = dma.vmem_to_hbm [thread:$0]  (%p3302_p11), %s3171_s0, 128, %s3169_s17, %s1519_s4  }
 0xae8 PF: > { %p2017_p12 = scmp.ge.s32.totalorder %s2570_s26, 2  ;;  %s1545_s28 = sand.u32 1, %s2550_s21  }
 0xae9   : > { %p3303_p3 = scmp.ne.s32.totalorder %s3282_s18, 0  ;;  %s1546_s7 = scalar_lea.sflag [#allocation7], %s1545_s28 }
 0xaeb   : > { %p1992_p2 = pnand %p2017_p12, %p3303_p3 }
 0xaed   : > { %2545 = dma.done.wait (!%p1992_p2), %s1546_s7, 128  }
 0xaee   : > { %2547 = vsyncadd (!%p1992_p2), %s1546_s7, 4294967168  ;;  %s32_s26 = sadd.s32 1, %s2570_s26   ;;  %s3304_s15 = sld [smem:[#allocation34_spill]] }
 0xaef   : > { %p29_p4 = scmp.ge.s32.totalorder %s32_s26, 4   ;;  %s3305_s21 = smov %s2554_s22 }
 0xaf0   : > { %s3306_s22 = smov %s2558_s23  ;;  %s3307_s23 = smov %s2874_s1 }
 0xaf1   : > { %s3308_s24 = smov %s2566_s25  ;;  %31 = sbr.rel (!%p29_p4) target bundleno = 25 (0x19), region = 167 }
 0xaf4   : > { %s3309_s25 = smov %s3304_s15 }
 0xaf8   :  { %1551 = vsyncpa [#allocation6], 1 }
 0xaf9   :  { %1553 = vsyncpa [#allocation6 + $0x1], 1 }
 0xafa   :  { %1554 = vsyncpa [#allocation9], 1 }
 0xafb   :  { %1555 = vsyncpa [#allocation12], 1 }
 0xafc   :  { %1556 = vsyncpa [#allocation15], 1 }
 0xafd   :  { %1557 = vsyncpa [#allocation18], 1 }
 0xafe   :  { %1558 = vsyncpa [#allocation21], 1 }
 0xaff   :  { %1559 = vsyncpa [#allocation24], 1 }
 0xb00   :  { %1560 = vsyncpa [#allocation7], 1 }
 0xb01   :  { %1562 = vsyncpa [#allocation7 + $0x1], 1 }

</bundles_post_ra>
